<compile_context>
chip_gen: v5e
topology: v5e:2x2
jax: 0.10.0
libtpu: 0.0.40
codegen_flags: <defaults>
</compile_context>

<pallas_src>
import functools
import math

import jax
import jax.numpy as jnp
from jax.experimental import pallas as pl
from jax.experimental.pallas import tpu as pltpu
from jax.scipy.linalg import block_diag


# ----------------------------- Pallas kernel ------------------------------ #

def _gdc_kernel(num_gate, d_model, x_ref, w_ref, out_ref):
    """One row-tile of the gated dynamic connection.

    x_ref : [tile_n, G*d_k]        lane-packed gate inputs
    w_ref : [G*d_k, 2*G*d_model]   block-diagonal [W1 | W2] (resident in VMEM)
    out   : [tile_n, d_model]
    """
    G, M = num_gate, d_model
    GM = G * M

    # Single lane-dense MXU matmul produces all v1/v2 gate projections at once:
    #   columns [g*M:(g+1)*M]        -> v1[g]
    #   columns [GM + g*M : ...]     -> v2[g]
    v = jnp.dot(x_ref[...], w_ref[...],
                preferred_element_type=jnp.float32)          # [tile_n, 2*GM]
    v1 = v[:, :GM]                                           # [tile_n, GM]
    v2 = v[:, GM:]                                           # [tile_n, GM]

    # Running max over the gate slabs of v2 (max-subtracted softmax, G is static).
    m = v2[:, :M]
    for g in range(1, G):
        m = jnp.maximum(m, v2[:, g * M:(g + 1) * M])

    # Broadcast the max back across all gate slabs so exp and the v1*exp multiply
    # each run ONCE over the full GM lane width (instead of G narrow passes).
    m_full = jnp.concatenate([m] * G, axis=1)                # [tile_n, GM]
    e = jnp.exp(v2 - m_full)                                 # one full-width EUP pass
    wv = v1 * e                                              # one full-width VPU pass

    # Slab-wise running sums over the gate axis (no [G, tile_n, M] temporaries).
    denom = e[:, :M]
    num = wv[:, :M]
    for g in range(1, G):
        denom = denom + e[:, g * M:(g + 1) * M]
        num = num + wv[:, g * M:(g + 1) * M]

    # Single reciprocal (EUP) replaces per-gate divides.
    out_ref[...] = (num * pl.reciprocal(denom)).astype(out_ref.dtype)


# ------------------------------ wrapper ----------------------------------- #

def gated_dynamic_connection_forward(data, w1, w2, *, tile_n=256):
    """data: [G, B, P, N, d_k]; w1, w2: [G, d_k, d_model] -> [B, P, N, d_model]."""
    G, B, P, N, d_k = data.shape
    d_model = w1.shape[2]
    NT = B * P * N
    GK = G * d_k
    GM = G * d_model

    # --- layout plumbing (wrapper-side, once) ---
    # Lane-dense gate packing: [NT, G*d_k], gate g occupies lanes [g*d_k:(g+1)*d_k].
    x = jnp.moveaxis(data, 0, -2).reshape(NT, GK).astype(jnp.float32)

    # Block-diagonal packed weights [G*d_k, 2*G*d_model] holding W1 | W2.
    w_packed = jnp.concatenate(
        [block_diag(*w1), block_diag(*w2)], axis=1).astype(jnp.float32)

    # Row tiling: clamp tile_n to a multiple of 8 and pad rows so no remainder
    # is silently dropped.
    tile_n = max(8, (tile_n // 8) * 8)
    tile_n = min(tile_n, ((NT + 7) // 8) * 8)
    nt_pad = pl.cdiv(NT, tile_n) * tile_n
    if nt_pad != NT:
        x = jnp.pad(x, ((0, nt_pad - NT), (0, 0)))

    grid = (nt_pad // tile_n,)
    kernel = functools.partial(_gdc_kernel, G, d_model)

    cost = pl.CostEstimate(
        flops=2 * nt_pad * GK * (2 * GM) + 6 * nt_pad * GM,
        transcendentals=nt_pad * GM,
        bytes_accessed=4 * (nt_pad * GK + GK * 2 * GM + nt_pad * d_model),
    )

    out = pl.pallas_call(
        kernel,
        out_shape=jax.ShapeDtypeStruct((nt_pad, d_model), jnp.float32),
        grid_spec=pltpu.PrefetchScalarGridSpec(
            num_scalar_prefetch=0,
            grid=grid,
            in_specs=[
                pl.BlockSpec((tile_n, GK), lambda i: (i, 0)),     # packed gate inputs
                pl.BlockSpec((GK, 2 * GM), lambda i: (0, 0)),     # packed W1|W2 (resident)
            ],
            out_specs=pl.BlockSpec((tile_n, d_model), lambda i: (i, 0)),
        ),
        compiler_params=pltpu.CompilerParams(
            dimension_semantics=("parallel",)),
        cost_estimate=cost,
    )(x, w_packed)

    return out[:NT].reshape(B, P, N, d_model)


# ------------------------------ reference --------------------------------- #

def gdc_reference(data, w1, w2):
    """Pure-JAX reference of Gated_Dynamic_Connection.forward (noGC=False)."""
    hi = jax.lax.Precision.HIGHEST
    v1 = jnp.einsum("gbpnk,gkm->bpngm", data, w1, precision=hi)
    v2 = jnp.einsum("gbpnk,gkm->bpngm", data, w2, precision=hi)
    a = jax.nn.softmax(v2, axis=-2)          # softmax over the gate axis
    return jnp.sum(v1 * a, axis=-2)          # [B, P, N, d_model]


# -------------------------------- main ------------------------------------ #

if __name__ == "__main__":
    # Small shapes consistent with the module.
    num_gate, d_k, d_model = 4, 32, 32
    B, P, N = 2, 4, 32                       # 256 total "node" rows

    key = jax.random.PRNGKey(0)
    kd, k1, k2 = jax.random.split(key, 3)
    data = jax.random.normal(kd, (num_gate, B, P, N, d_k), jnp.float32)
    xavier = math.sqrt(2.0 / (d_k + d_model))          # nn.init.xavier_normal_
    w1 = jax.random.normal(k1, (num_gate, d_k, d_model), jnp.float32) * xavier
    w2 = jax.random.normal(k2, (num_gate, d_k, d_model), jnp.float32) * xavier

    # tile_n=128 -> grid of 2 parallel steps (keeps both v7x TensorCores busy).
    out = gated_dynamic_connection_forward(data, w1, w2, tile_n=128)
    out = jax.block_until_ready(out)

    ref = gdc_reference(data, w1, w2)
    assert out.shape == (B, P, N, d_model)
    assert jnp.allclose(out, ref, atol=1e-4, rtol=1e-4), "mismatch vs JAX reference"

    print("KERNEL_OK")
</pallas_src>

<mosaic_0001>
module attributes {stable_mosaic.version = 11 : i64} {
  func.func @_gdc_kernel(%arg0: i32, %arg1: memref<128x128xf32, #tpu.memory_space<vmem>>, %arg2: memref<128x256xf32, #tpu.memory_space<vmem>>, %arg3: memref<128x32xf32, #tpu.memory_space<vmem>>) attributes {dimension_semantics = [#tpu.dimension_semantics<parallel>], iteration_bounds = array<i64: 2>, scalar_prefetch = 0 : i64, scratch_operands = 0 : i64, tpu.core_type = #tpu.core_type<tc>, window_params = [{transform_indices = @transform_0, window_bounds = array<i64: 128, 128>}, {pipeline_mode = #tpu.pipeline_mode<synchronous>, transform_indices = @transform_1, window_bounds = array<i64: 128, 256>}, {transform_indices = @transform_2, window_bounds = array<i64: 128, 32>}]} {
    %c0 = arith.constant 0 : index
    %c0_0 = arith.constant 0 : index
    %0 = vector.load %arg1[%c0, %c0_0] : memref<128x128xf32, #tpu.memory_space<vmem>>, vector<128x128xf32>
    %c0_1 = arith.constant 0 : index
    %c0_2 = arith.constant 0 : index
    %1 = vector.load %arg2[%c0_1, %c0_2] : memref<128x256xf32, #tpu.memory_space<vmem>>, vector<128x256xf32>
    %cst = arith.constant dense<0.000000e+00> : vector<128x256xf32>
    %2 = tpu.matmul %0, %1, %cst {dimension_numbers = #tpu.dot_dimension_numbers<[1], [0], [0], [1], [0, 0, 1, 1], [], []>} : vector<128x128xf32>, vector<128x256xf32>, vector<128x256xf32> -> vector<128x256xf32>
    %3 = vector.extract_strided_slice %2 {offsets = [0, 0], sizes = [128, 128], strides = [1, 1]} : vector<128x256xf32> to vector<128x128xf32>
    %4 = vector.extract_strided_slice %2 {offsets = [0, 128], sizes = [128, 128], strides = [1, 1]} : vector<128x256xf32> to vector<128x128xf32>
    %5 = vector.extract_strided_slice %4 {offsets = [0, 0], sizes = [128, 32], strides = [1, 1]} : vector<128x128xf32> to vector<128x32xf32>
    %6 = vector.extract_strided_slice %4 {offsets = [0, 32], sizes = [128, 32], strides = [1, 1]} : vector<128x128xf32> to vector<128x32xf32>
    %7 = arith.maximumf %5, %6 : vector<128x32xf32>
    %8 = vector.extract_strided_slice %4 {offsets = [0, 64], sizes = [128, 32], strides = [1, 1]} : vector<128x128xf32> to vector<128x32xf32>
    %9 = arith.maximumf %7, %8 : vector<128x32xf32>
    %10 = vector.extract_strided_slice %4 {offsets = [0, 96], sizes = [128, 32], strides = [1, 1]} : vector<128x128xf32> to vector<128x32xf32>
    %11 = arith.maximumf %9, %10 : vector<128x32xf32>
    %12 = tpu.concatenate %11, %11, %11, %11 in 1 : vector<128x32xf32>, vector<128x32xf32>, vector<128x32xf32>, vector<128x32xf32> -> vector<128x128xf32>
    %13 = arith.subf %4, %12 : vector<128x128xf32>
    %14 = math.exp %13 : vector<128x128xf32>
    %15 = arith.mulf %3, %14 : vector<128x128xf32>
    %16 = vector.extract_strided_slice %14 {offsets = [0, 0], sizes = [128, 32], strides = [1, 1]} : vector<128x128xf32> to vector<128x32xf32>
    %17 = vector.extract_strided_slice %15 {offsets = [0, 0], sizes = [128, 32], strides = [1, 1]} : vector<128x128xf32> to vector<128x32xf32>
    %18 = vector.extract_strided_slice %14 {offsets = [0, 32], sizes = [128, 32], strides = [1, 1]} : vector<128x128xf32> to vector<128x32xf32>
    %19 = arith.addf %16, %18 : vector<128x32xf32>
    %20 = vector.extract_strided_slice %15 {offsets = [0, 32], sizes = [128, 32], strides = [1, 1]} : vector<128x128xf32> to vector<128x32xf32>
    %21 = arith.addf %17, %20 : vector<128x32xf32>
    %22 = vector.extract_strided_slice %14 {offsets = [0, 64], sizes = [128, 32], strides = [1, 1]} : vector<128x128xf32> to vector<128x32xf32>
    %23 = arith.addf %19, %22 : vector<128x32xf32>
    %24 = vector.extract_strided_slice %15 {offsets = [0, 64], sizes = [128, 32], strides = [1, 1]} : vector<128x128xf32> to vector<128x32xf32>
    %25 = arith.addf %21, %24 : vector<128x32xf32>
    %26 = vector.extract_strided_slice %14 {offsets = [0, 96], sizes = [128, 32], strides = [1, 1]} : vector<128x128xf32> to vector<128x32xf32>
    %27 = arith.addf %23, %26 : vector<128x32xf32>
    %28 = vector.extract_strided_slice %15 {offsets = [0, 96], sizes = [128, 32], strides = [1, 1]} : vector<128x128xf32> to vector<128x32xf32>
    %29 = arith.addf %25, %28 : vector<128x32xf32>
    %30 = tpu.reciprocal %27 : vector<128x32xf32> -> vector<128x32xf32>
    %31 = arith.mulf %29, %30 : vector<128x32xf32>
    %c0_3 = arith.constant 0 : index
    %c0_4 = arith.constant 0 : index
    %32 = vector.load %arg3[%c0_3, %c0_4] : memref<128x32xf32, #tpu.memory_space<vmem>>, vector<128x32xf32>
    tpu.vector_store %arg3[%c0_3, %c0_4], %31 {strides = array<i32>} : memref<128x32xf32, #tpu.memory_space<vmem>>, vector<128x32xf32>,
    return
  }
  func.func @transform_0(%arg0: i32) -> (i32, i32) {
    %c0_i32 = arith.constant 0 : i32
    %c0_i32_0 = arith.constant 0 : i32
    return %arg0, %c0_i32 : i32, i32
  }
  func.func @transform_1(%arg0: i32) -> (i32, i32) {
    %c0_i32 = arith.constant 0 : i32
    %c0_i32_0 = arith.constant 0 : i32
    %c0_i32_1 = arith.constant 0 : i32
    return %c0_i32, %c0_i32_0 : i32, i32
  }
  func.func @transform_2(%arg0: i32) -> (i32, i32) {
    %c0_i32 = arith.constant 0 : i32
    %c0_i32_0 = arith.constant 0 : i32
    return %arg0, %c0_i32 : i32, i32
  }
}

</mosaic_0001>

<bundles_post_ra>
// kernel: tpu_custom_call.1
= control target key start
LH: loop header
LB: loop body
LE: loop exit
PB: predicated region body
PF: predicated region fallthrough
CT: control target
= control target key end

     0   :  { %7 = vsyncpa [#allocation3], 0  ;;  %s3091_s0 = inlined_call_operand.hbm [shape: f32[256,128], index: 0, kind: input, shape index: {}]   ;;  %s3092_s1 = inlined_call_operand.hbm [shape: f32[128,256], index: 1, kind: input, shape index: {}]   ;;  %s3093_s2 = inlined_call_operand.vmem [shape: f32[256,32], index: 2, kind: output, shape index: {}]  }
   0x1   :  { %9 = vsyncpa [#allocation3 + $0x1], 0 }
   0x2   :  { %10 = vsyncpa [#allocation5], 0  ;;  %s1887_s9 = smov 0   ;;  %s1889_s10 = smov 0  }
   0x3   :  { %s1891_s11 = smov 0   ;;  %s1893_s12 = smov 0  }
   0x4 LB: > { %s1595_s13 = sadd.s32 4294967295, %s1862_s12   ;;  %p36_p0 = scmp.ne.s32.totalorder %s1854_s10, %s1850_s9  ;;  %s1862_s12 = sphi %s1893_s12, %s3117_s12   ;;  %s1858_s11 = sphi %s1891_s11, %s3116_s11   ;;  %s1854_s10 = sphi %s1889_s10, %s3115_s10   ;;  %s1850_s9 = sphi %s1887_s9, %s3114_s9  }
   0x5   : > { %p1909_p1 = scmp.eq.s32.totalorder %s1595_s13, 0  ;;  %p1597_p2 = scmp.ge.s32.totalorder %s1862_s12, 1 }
   0x6   : > { %p94_p3 = scmp.lt.s32.totalorder %s1862_s12, 3  ;;  %s105_s18 = sshll.u32 %s3092_s1, 4  ;;  %s106_s18 = int_to_ptr.hbm [resolvable:$true] %s105_s18 }
   0x7   : > { %p1917_p4 = por %p1909_p1, %p36_p0  ;;  %s1864_s20 = smov [#allocation4]  }
   0x8   : > { %p1924_p5 = pnand %p1597_p2, %p94_p3  ;;  %s107_s21 = sshll.u32 %s1864_s20, 4  ;;  %s108_s21 = int_to_ptr.vmem [resolvable:$true] %s107_s21 }
   0x9   : > { %s1933_s22 = sadd.s32 1, %s1862_s12   ;;  %s1865_s23 = smov 256  }
   0xa   : > { %p1649_p6 = pneg %p1924_p5  ;;  %s1866_s24 = smov 16  }
   0xb   : > { %s20_s25 = ssub.s32 %s1862_s12, %s1933_s22  ;;  %s23_s26 = sadd.s32 1, %s1858_s11 }
   0xc   : > { %p1650_p7 = pnand %p1649_p6, %p1909_p1  ;;  %p21_p8 = scmp.eq.s32.totalorder %s20_s25, 0 }
   0xd   : > { %p30_p9 = scmp.ne.s32.totalorder %s1858_s11, %s1854_s10  ;;  %p31_p10 = scmp.eq.s32.totalorder %s1862_s12, 0 }
   0xe   : > { %1652 = dma.hbm_to_vmem [thread:$0]  (!%p1650_p7), %s106_s18, 4096, %s108_s21, [#allocation5], %s1865_s23, %s1865_s23, %s1866_s24  }
   0xf   : > { %p1658_p11 = scmp.lt.s32.totalorder %s1862_s12, 2  ;;  %p32_p12 = por %p31_p10, %p30_p9 }
  0x10   : > { %s1943_s27 = scalar_select %p21_p8, %s1858_s11, %s23_s26  }
  0x11   : > { %s121_s28 = sand.u32 1, %s1858_s11   ;;  %s1610_s30 = sshll.u32 %s1862_s12, 7 }
  0x12   : > { %s1600_s29 = sshll.u32 %s121_s28, 7  ;;  %s130_s5 = scalar_lea.hbm %s3091_s0, %s1610_s30 }
  0x13   : > { %s125_s6 = scalar_lea.vmem [#allocation2], %s1600_s29  ;;  %s131_s8 = sshll.u32 %s130_s5, 4  ;;  %s132_s8 = int_to_ptr.hbm [resolvable:$true] %s131_s8 }
  0x14   : > { %s133_s7 = sshll.u32 %s125_s6, 4  ;;  %p1950_p13 = pnand %p1658_p11, %p32_p12  ;;  %s134_s7 = int_to_ptr.vmem [resolvable:$true] %s133_s7 }
  0x15   : > { %s122_s16 = scalar_lea.sflag [#allocation3], %s121_s28  ;;  %s1794_s17 = sshra.s32 %s132_s8, 4  ;;  %s1795_s17 = int_to_ptr.hbm [resolvable:$true] %s1794_s17 }
  0x16   : > { %s1796_s18 = scalar_lea.hbm %s1795_s17, 128  ;;  %p1798_p2 = pneg %p1950_p13 }
  0x17   : > { %p1797_p0 = scmp.ne.s32.totalorder %s1795_s17, %s1796_s18  ;;  %s1801_s23 = scalar_lea.hbm %s3091_s0, 256 }
  0x18   : > { %p1802_p7 = scmp.lt.s32.totalorder %s1795_s17, %s3091_s0  ;;  %p1803_p8 = scmp.lt.s32.totalorder %s1801_s23, %s1796_s18 }
  0x19   : > { %p1799_p3 = pnand %p1798_p2, %p1797_p0 }
  0x1a   : > { %p1804_p9 = por %p1803_p8, %p1802_p7 }
  0x1b   : > { %p1800_p6 = pneg %p1799_p3 }
  0x1d   : > { %p1805_p10 = pnand %p1804_p9, %p1800_p6 }
  0x1f   : > { %1808 = shalt.err (!%p1805_p10)
}
  0x20   : > { %s1867_s26 = smov 128   ;;  %s1868_s28 = smov 8  }
  0x21   : > { %1656 = dma.hbm_to_vmem [thread:$0]  (!%p1950_p13), %s132_s8, 2048, %s134_s7, %s122_s16, %s1867_s26, %s1867_s26, %s1868_s28  }
  0x22   : > { %145 = sbr.rel (%p1924_p5) target bundleno = 827 (0x33b), region = 28  ;;  %s147_s29 = sand.u32 (!%p1924_p5), 1, %s1854_s10  }
  0x23   : > { %s1604_s30 = sshll.u32 (!%p1924_p5), %s147_s29, 7  ;;  %s148_s3 = scalar_lea.sflag (!%p1924_p5), [#allocation3], %s147_s29 }
  0x24   : > { %s1967_s4 = scalar_lea.vmem (!%p1924_p5), [#allocation2], %s1604_s30 }
  0x27   : > { %1841 = dma.done.wait (%p1917_p4), %s148_s3, 2048  }
  0x28   : > { %1843 = vsyncadd (%p1917_p4), %s148_s3, 4294965248 }
  0x29   : > { %1845 = dma.done.wait (%p1909_p1), [#allocation5], 4096  }
  0x2a   : > { %1847 = vsyncadd (%p1909_p1), [#allocation5], 4294963200  ;;  %v232_v0 = vld [vmem:[#allocation4 + $0xf8] sm:$0xff]  ;;  %v230_v1 = vld [vmem:[#allocation4 + $0xe8] sm:$0xff]  ;;  %s1869_s14 = smov 32   ;;  %s1870_s15 = smov 64  }
  0x2b   : > { %298 = vmatpush.msra.mxu1 %v232_v0  ;;  %1627 = vmatpush.msra.mxu3 %v232_v0  ;;  %v228_v2 = vld [vmem:[#allocation4 + $0xd8] sm:$0xff]  ;;  %v226_v3 = vld [vmem:[#allocation4 + $0xc8] sm:$0xff]  ;;  %v1978_v16 = vld [vmem:[%s1967_s4] sm:$0xff]  ;;  %s1871_s19 = smov 96   ;;  %vm748_vm0 = vcmask 523264   ;;  %vm731_vm1 = vcmask 261120  }
  0x2c   : > { %v224_v4 = vld [vmem:[#allocation4 + $0xb8] sm:$0xff]  ;;  %v222_v5 = vld [vmem:[#allocation4 + $0xa8] sm:$0xff]  ;;  %v1981_v17 = vld [vmem:[%s1967_s4 + $0x40] sm:$0xff]  ;;  %vm765_vm2 = vcmask 785408   ;;  %s1606_s5 = sshll.u32 %s1595_s13, 4 }
  0x2d   : > { %299 = vmatpush.msra.mxu1 %v230_v1  ;;  %1628 = vmatpush.msra.mxu3 %v230_v1  ;;  %v220_v6 = vld [vmem:[#allocation4 + $0x98] sm:$0xff]  ;;  %v218_v7 = vld [vmem:[#allocation4 + $0x88] sm:$0xff]  ;;  %v1994_v20 = vld [vmem:[%s1967_s4 + $0x10] sm:$0xff]  ;;  %p180_p1 = scmp.lt.s32.totalorder %s1606_s5, 31 }
  0x2e   : > { %v216_v8 = vld [vmem:[#allocation4 + $0x78] sm:$0xff]  ;;  %v214_v9 = vld [vmem:[#allocation4 + $0x68] sm:$0xff]  ;;  %v1997_v21 = vld [vmem:[%s1967_s4 + $0x50] sm:$0xff] }
  0x2f   : > { %300 = vmatpush.msra.mxu1 %v228_v2  ;;  %1629 = vmatpush.msra.mxu3 %v228_v2  ;;  %v212_v10 = vld [vmem:[#allocation4 + $0x58] sm:$0xff]  ;;  %v210_v11 = vld [vmem:[#allocation4 + $0x48] sm:$0xff]  ;;  %v2010_v24 = vld [vmem:[%s1967_s4 + $0x20] sm:$0xff]  ;;  %s3119_s5 = smov (!%p180_p1, %s1606_s5), 31 }
  0x30   : > { %v208_v12 = vld [vmem:[#allocation4 + $0x38] sm:$0xff]  ;;  %v206_v13 = vld [vmem:[#allocation4 + $0x28] sm:$0xff]  ;;  %v2013_v25 = vld [vmem:[%s1967_s4 + $0x60] sm:$0xff]  ;;  %s1607_s12 = sshll.u32 %s3119_s5, 3 }
  0x31   : > { %301 = vmatpush.msra.mxu1 %v226_v3  ;;  %1630 = vmatpush.msra.mxu3 %v226_v3  ;;  %v204_v14 = vld [vmem:[#allocation4 + $0x18] sm:$0xff]  ;;  %v202_v15 = vld [vmem:[#allocation4 + $0x8] sm:$0xff]  ;;  %v2026_v28 = vld [vmem:[%s1967_s4 + $0x30] sm:$0xff]  ;;  %s2619_s7 = scalar_lea.vmem %s3093_s2, %s1607_s12 }
  0x32   : > { %v1986_v18 = vld [vmem:[%s1967_s4 + $0x48] sm:$0xff]  ;;  %v2002_v22 = vld [vmem:[%s1967_s4 + $0x18] sm:$0xff]  ;;  %v2029_v29 = vld [vmem:[%s1967_s4 + $0x70] sm:$0xff] }
  0x33   : > { %302 = vmatpush.msra.mxu1 %v224_v4  ;;  %1631 = vmatpush.msra.mxu3 %v224_v4  ;;  %v1989_v19 = vld [vmem:[%s1967_s4 + $0x8] sm:$0xff]  ;;  %v2005_v23 = vld [vmem:[%s1967_s4 + $0x58] sm:$0xff]  ;;  %v231_v41 = vld [vmem:[#allocation4 + $0xf0] sm:$0xff] }
  0x34   : > { %v2018_v26 = vld [vmem:[%s1967_s4 + $0x28] sm:$0xff]  ;;  %v2034_v30 = vld [vmem:[%s1967_s4 + $0x38] sm:$0xff]  ;;  %v229_v42 = vld [vmem:[#allocation4 + $0xe0] sm:$0xff]  ;;  %233 = vmatpush.msra.mxu0 %v231_v41  ;;  %1611 = vmatpush.msra.mxu2 %v231_v41 }
  0x35   : > { %303 = vmatpush.msra.mxu1 %v222_v5  ;;  %1632 = vmatpush.msra.mxu3 %v222_v5  ;;  %v2021_v27 = vld [vmem:[%s1967_s4 + $0x68] sm:$0xff]  ;;  %v2037_v31 = vld [vmem:[%s1967_s4 + $0x78] sm:$0xff]  ;;  %v227_v44 = vld [vmem:[#allocation4 + $0xd0] sm:$0xff] }
  0x36   : > { %234 = vmatpush.msra.mxu0 %v229_v42  ;;  %1612 = vmatpush.msra.mxu2 %v229_v42  ;;  %v225_v45 = vld [vmem:[#allocation4 + $0xc0] sm:$0xff]  ;;  %v223_v46 = vld [vmem:[#allocation4 + $0xb0] sm:$0xff] }
  0x37   : > { %304 = vmatpush.msra.mxu1 %v220_v6  ;;  %1633 = vmatpush.msra.mxu3 %v220_v6  ;;  %v221_v47 = vld [vmem:[#allocation4 + $0xa0] sm:$0xff]  ;;  %v219_v49 = vld [vmem:[#allocation4 + $0x90] sm:$0xff] }
  0x38   : > { %235 = vmatpush.msra.mxu0 %v227_v44  ;;  %1613 = vmatpush.msra.mxu2 %v227_v44  ;;  %v217_v50 = vld [vmem:[#allocation4 + $0x80] sm:$0xff]  ;;  %v215_v51 = vld [vmem:[#allocation4 + $0x70] sm:$0xff] }
  0x39   : > { %305 = vmatpush.msra.mxu1 %v218_v7  ;;  %1634 = vmatpush.msra.mxu3 %v218_v7  ;;  %v213_v53 = vld [vmem:[#allocation4 + $0x60] sm:$0xff]  ;;  %v211_v54 = vld [vmem:[#allocation4 + $0x50] sm:$0xff] }
  0x3a   : > { %236 = vmatpush.msra.mxu0 %v225_v45  ;;  %1614 = vmatpush.msra.mxu2 %v225_v45  ;;  %v209_v56 = vld [vmem:[#allocation4 + $0x40] sm:$0xff]  ;;  %v207_v57 = vld [vmem:[#allocation4 + $0x30] sm:$0xff] }
  0x3b   : > { %306 = vmatpush.msra.mxu1 %v216_v8  ;;  %1635 = vmatpush.msra.mxu3 %v216_v8  ;;  %v205_v59 = vld [vmem:[#allocation4 + $0x20] sm:$0xff]  ;;  %v203_v60 = vld [vmem:[#allocation4 + $0x10] sm:$0xff] }
  0x3c   : > { %237 = vmatpush.msra.mxu0 %v223_v46  ;;  %1615 = vmatpush.msra.mxu2 %v223_v46  ;;  %v201_v62 = vld [vmem:[#allocation4] sm:$0xff] }
  0x3d   : > { %307 = vmatpush.msra.mxu1 %v214_v9  ;;  %1636 = vmatpush.msra.mxu3 %v214_v9 }
  0x3e   : > { %238 = vmatpush.msra.mxu0 %v221_v47  ;;  %1616 = vmatpush.msra.mxu2 %v221_v47 }
  0x3f   : > { %308 = vmatpush.msra.mxu1 %v212_v10  ;;  %1637 = vmatpush.msra.mxu3 %v212_v10 }
  0x40   : > { %239 = vmatpush.msra.mxu0 %v219_v49  ;;  %1617 = vmatpush.msra.mxu2 %v219_v49 }
  0x41   : > { %309 = vmatpush.msra.mxu1 %v210_v11  ;;  %1638 = vmatpush.msra.mxu3 %v210_v11 }
  0x42   : > { %240 = vmatpush.msra.mxu0 %v217_v50  ;;  %1618 = vmatpush.msra.mxu2 %v217_v50 }
  0x43   : > { %310 = vmatpush.msra.mxu1 %v208_v12  ;;  %1639 = vmatpush.msra.mxu3 %v208_v12 }
  0x44   : > { %241 = vmatpush.msra.mxu0 %v215_v51  ;;  %1619 = vmatpush.msra.mxu2 %v215_v51 }
  0x45   : > { %311 = vmatpush.msra.mxu1 %v206_v13  ;;  %1640 = vmatpush.msra.mxu3 %v206_v13 }
  0x46   : > { %242 = vmatpush.msra.mxu0 %v213_v53  ;;  %1620 = vmatpush.msra.mxu2 %v213_v53 }
  0x47   : > { %312 = vmatpush.msra.mxu1 %v204_v14  ;;  %1641 = vmatpush.msra.mxu3 %v204_v14 }
  0x48   : > { %243 = vmatpush.msra.mxu0 %v211_v54  ;;  %1621 = vmatpush.msra.mxu2 %v211_v54 }
  0x49   : > { %313 = vmatpush.msra.mxu1 %v202_v15  ;;  %1642 = vmatpush.msra.mxu3 %v202_v15 }
  0x4a   : > { %314 = vmatmul.f32.vlgmr.msra.gmra.mxu1 %v1978_v16  ;;  %338 = vmatmul.f32.vlgmr.msra.gmra.mxu3 %v1981_v17 }
  0x4b   : > { %244 = vmatpush.msra.mxu0 %v209_v56  ;;  %1622 = vmatpush.msra.mxu2 %v209_v56 }
  0x4d   : > { %245 = vmatpush.msra.mxu0 %v207_v57  ;;  %1623 = vmatpush.msra.mxu2 %v207_v57 }
  0x4f   : > { %246 = vmatpush.msra.mxu0 %v205_v59  ;;  %1624 = vmatpush.msra.mxu2 %v205_v59 }
  0x51   : > { %247 = vmatpush.msra.mxu0 %v203_v60  ;;  %1625 = vmatpush.msra.mxu2 %v203_v60 }
  0x52   : > { %341 = vmatmul.f32.gmra.mxu3 %v1986_v18  ;;  %317 = vmatmul.f32.gmra.mxu1 %v1989_v19 }
  0x53   : > { %248 = vmatpush.msra.mxu0 %v201_v62  ;;  %1626 = vmatpush.msra.mxu2 %v201_v62 }
  0x54   : > { %249 = vmatmul.f32.vlgmr.msra.gmra.mxu0 %v1978_v16  ;;  %273 = vmatmul.f32.vlgmr.msra.gmra.mxu2 %v1981_v17 }
  0x5a   : > { %320 = vmatmul.f32.gmra.mxu1 %v1994_v20  ;;  %344 = vmatmul.f32.gmra.mxu3 %v1997_v21 }
  0x5c   : > { %252 = vmatmul.f32.gmra.mxu0 %v1989_v19  ;;  %276 = vmatmul.f32.gmra.mxu2 %v1986_v18 }
  0x62   : > { %323 = vmatmul.f32.gmra.mxu1 %v2002_v22  ;;  %347 = vmatmul.f32.gmra.mxu3 %v2005_v23 }
  0x64   : > { %255 = vmatmul.f32.gmra.mxu0 %v1994_v20  ;;  %279 = vmatmul.f32.gmra.mxu2 %v1997_v21 }
  0x6a   : > { %326 = vmatmul.f32.gmra.mxu1 %v2010_v24  ;;  %350 = vmatmul.f32.gmra.mxu3 %v2013_v25 }
  0x6c   : > { %258 = vmatmul.f32.gmra.mxu0 %v2002_v22  ;;  %282 = vmatmul.f32.gmra.mxu2 %v2005_v23 }
  0x72   : > { %329 = vmatmul.f32.gmra.mxu1 %v2018_v26  ;;  %353 = vmatmul.f32.gmra.mxu3 %v2021_v27 }
  0x74   : > { %261 = vmatmul.f32.gmra.mxu0 %v2010_v24  ;;  %285 = vmatmul.f32.gmra.mxu2 %v2013_v25 }
  0x7a   : > { %332 = vmatmul.f32.gmra.mxu1 %v2026_v28  ;;  %356 = vmatmul.f32.gmra.mxu3 %v2029_v29 }
  0x7c   : > { %264 = vmatmul.f32.gmra.mxu0 %v2018_v26  ;;  %288 = vmatmul.f32.gmra.mxu2 %v2021_v27 }
  0x82   : > { %335 = vmatmul.f32.gmra.mxu1 %v2034_v30  ;;  %359 = vmatmul.f32.gmra.mxu3 %v2037_v31 }
  0x84   : > { %267 = vmatmul.f32.gmra.mxu0 %v2026_v28  ;;  %291 = vmatmul.f32.gmra.mxu2 %v2029_v29 }
  0x8c   : > { %270 = vmatmul.f32.gmra.mxu0 %v2034_v30  ;;  %294 = vmatmul.f32.gmra.mxu2 %v2037_v31 }
  0xc7   : > { %v2041_v32 = vpop.f32.mrf.mxu1 }
  0xc8   : > { %507 = vrot.lane.b32.xlu2 %v2041_v32, %s1869_s14  ;;  %443 = vrot.lane.b32.xlu1 %v2041_v32, %s1870_s15 }
  0xc9   : > { %379 = vrot.lane.b32.xlu0 %v2041_v32, %s1871_s19 }
  0xcd   : > { %v2049_v33 = vpop.f32.mrf.mxu3 }
  0xcf   : > { %v2057_v34 = vpop.f32.mrf.mxu1 }
  0xd0   : > { %395 = vrot.lane.b32.xlu2 %v2049_v33, %s1871_s19  ;;  %523 = vrot.lane.b32.xlu1 %v2049_v33, %s1869_s14 }
  0xd1   : > { %459 = vrot.lane.b32.xlu0 %v2049_v33, %s1870_s15 }
  0xd5   : > { %v2059_v35 = vpop.f32.mrf.mxu3 }
  0xd7   : > { %v2067_v36 = vpop.f32.mrf.mxu1 }
  0xd8   : > { %461 = vrot.lane.b32.xlu1 %v2059_v35, %s1870_s15  ;;  %445 = vrot.lane.b32.xlu2 %v2057_v34, %s1870_s15 }
  0xd9   : > { %381 = vrot.lane.b32.xlu0 %v2057_v34, %s1871_s19 }
  0xdd   : > { %v2075_v37 = vpop.f32.mrf.mxu3 }
  0xdf   : > { %v2083_v38 = vpop.f32.mrf.mxu1 }
  0xe0   : > { %525 = vrot.lane.b32.xlu2 %v2059_v35, %s1869_s14  ;;  %383 = vrot.lane.b32.xlu1 %v2067_v36, %s1871_s19 }
  0xe1   : > { %509 = vrot.lane.b32.xlu0 %v2057_v34, %s1869_s14 }
  0xe5   : > { %v2091_v39 = vpop.f32.mrf.mxu3 }
  0xe7   : > { %v2099_v40 = vpop.f32.mrf.mxu1 }
  0xe8   : > { %463 = vrot.lane.b32.xlu2 %v2075_v37, %s1870_s15  ;;  %511 = vrot.lane.b32.xlu1 %v2067_v36, %s1869_s14 }
  0xe9   : > { %397 = vrot.lane.b32.xlu0 %v2059_v35, %s1871_s19 }
  0xed   : > { %v2113_v43 = vpop.f32.mrf.mxu3 }
  0xef   : > { %v2121_v48 = vpop.f32.mrf.mxu1 }
  0xf0   : > { %399 = vrot.lane.b32.xlu1 %v2075_v37, %s1871_s19  ;;  %513 = vrot.lane.b32.xlu2 %v2083_v38, %s1869_s14 }
  0xf1   : > { %447 = vrot.lane.b32.xlu0 %v2067_v36, %s1870_s15 }
  0xf5   : > { %v2129_v52 = vpop.f32.mrf.mxu3 }
  0xf7   : > { %v2137_v58 = vpop.f32.mrf.mxu1 }
  0xf8   : > { %401 = vrot.lane.b32.xlu2 %v2091_v39, %s1871_s19  ;;  %385 = vrot.lane.b32.xlu1 %v2083_v38, %s1871_s19 }
  0xf9   : > { %527 = vrot.lane.b32.xlu0 %v2075_v37, %s1869_s14 }
  0xfd   : > { %v2145_v63 = vpop.f32.mrf.mxu3 }
  0xff   : > { %v2155_v1 = vpop.f32.mrf.mxu1 }
 0x100   : > { %449 = vrot.lane.b32.xlu1 %v2083_v38, %s1870_s15  ;;  %387 = vrot.lane.b32.xlu2 %v2099_v40, %s1871_s19 }
 0x101   : > { %465 = vrot.lane.b32.xlu0 %v2091_v39, %s1870_s15 }
 0x105   : > { %v2165_v5 = vpop.f32.mrf.mxu3 }
 0x108   : > { %529 = vrot.lane.b32.xlu1 %v2091_v39, %s1869_s14  ;;  %451 = vrot.lane.b32.xlu2 %v2099_v40, %s1870_s15 }
 0x109   : > { %515 = vrot.lane.b32.xlu0 %v2099_v40, %s1869_s14 }
 0x110   : > { %467 = vrot.lane.b32.xlu1 %v2113_v43, %s1870_s15  ;;  %531 = vrot.lane.b32.xlu2 %v2113_v43, %s1869_s14 }
 0x111   : > { %403 = vrot.lane.b32.xlu0 %v2113_v43, %s1871_s19 }
 0x118   : > { %517 = vrot.lane.b32.xlu1 %v2121_v48, %s1869_s14  ;;  %389 = vrot.lane.b32.xlu2 %v2121_v48, %s1871_s19 }
 0x119   : > { %453 = vrot.lane.b32.xlu0 %v2121_v48, %s1870_s15 }
 0x120   : > { %405 = vrot.lane.b32.xlu1 %v2129_v52, %s1871_s19  ;;  %469 = vrot.lane.b32.xlu2 %v2129_v52, %s1870_s15 }
 0x121   : > { %533 = vrot.lane.b32.xlu0 %v2129_v52, %s1869_s14 }
 0x122   : > { %v508_v55 = vpop.permute.xlu2 %507 }
 0x128   : > { %519 = vrot.lane.b32.xlu2 %v2137_v58, %s1869_s14  ;;  %455 = vrot.lane.b32.xlu1 %v2137_v58, %s1870_s15 }
 0x129   : > { %391 = vrot.lane.b32.xlu0 %v2137_v58, %s1871_s19 }
 0x12a   : > { %v396_v61 = vpop.permute.xlu2 %395 }
 0x12b   : > { %v435_v12 = vmax.f32 %v2049_v33, %v396_v61 }
 0x130   : > { %407 = vrot.lane.b32.xlu2 %v2145_v63, %s1871_s19  ;;  %535 = vrot.lane.b32.xlu1 %v2145_v63, %s1869_s14 }
 0x131   : > { %471 = vrot.lane.b32.xlu0 %v2145_v63, %s1870_s15 }
 0x132   : > { %v446_v0 = vpop.permute.xlu2 %445 }
 0x138   : > { %457 = vrot.lane.b32.xlu2 %v2155_v1, %s1870_s15  ;;  %393 = vrot.lane.b32.xlu1 %v2155_v1, %s1871_s19 }
 0x139   : > { %521 = vrot.lane.b32.xlu0 %v2155_v1, %s1869_s14 }
 0x13a   : > { %v444_v2 = vpop.permute.xlu1 %443  ;;  %v526_v3 = vpop.permute.xlu2 %525 }
 0x13b   : > { %v380_v4 = vpop.permute.xlu0 %379 }
 0x13c   : > { %v427_v6 = vmax.f32 %v2041_v32, %v380_v4 }
 0x13e   : > { %v491_v7 = vmax.f32 %v427_v6, %v444_v2 }
 0x140   : > { %537 = vrot.lane.b32.xlu2 %v2165_v5, %s1869_s14  ;;  %473 = vrot.lane.b32.xlu1 %v2165_v5, %s1870_s15  ;;  %v2176_v11 = vmax.f32 %v491_v7, %v508_v55 }
 0x141   : > { %409 = vrot.lane.b32.xlu0 %v2165_v5, %s1871_s19 }
 0x142   : > { %v524_v8 = vpop.permute.xlu1 %523  ;;  %v464_v9 = vpop.permute.xlu2 %463 }
 0x143   : > { %v460_v10 = vpop.permute.xlu0 %459 }
 0x144   : > { %v499_v13 = vmax.f32 %v435_v12, %v460_v10 }
 0x146   : > { %v2187_v17 = vmax.f32 %v499_v13, %v524_v8 }
 0x148   : > { %683 = vrot.lane.b32.xlu2 %v2176_v11, %s1871_s19  ;;  %635 = vrot.lane.b32.xlu1 %v2176_v11, %s1870_s15 }
 0x149   : > { %587 = vrot.lane.b32.xlu0 %v2176_v11, %s1869_s14 }
 0x14a   : > { %v462_v14 = vpop.permute.xlu1 %461  ;;  %v514_v15 = vpop.permute.xlu2 %513 }
 0x14b   : > { %v382_v16 = vpop.permute.xlu0 %381 }
 0x14c   : > { %v428_v18 = vmax.f32 %v2057_v34, %v382_v16 }
 0x14e   : > { %v492_v22 = vmax.f32 %v428_v18, %v446_v0 }
 0x150   : > { %603 = vrot.lane.b32.xlu2 %v2187_v17, %s1869_s14  ;;  %699 = vrot.lane.b32.xlu1 %v2187_v17, %s1871_s19 }
 0x151   : > { %651 = vrot.lane.b32.xlu0 %v2187_v17, %s1870_s15 }
 0x152   : > { %v384_v19 = vpop.permute.xlu1 %383  ;;  %v402_v20 = vpop.permute.xlu2 %401 }
 0x153   : > { %v510_v21 = vpop.permute.xlu0 %509  ;;  %v429_v45 = vmax.f32 %v2067_v36, %v384_v19  ;;  %v438_v2 = vmax.f32 %v2091_v39, %v402_v20 }
 0x154   : > { %v2198_v23 = vmax.f32 %v492_v22, %v510_v21 }
 0x158   : > { %637 = vrot.lane.b32.xlu2 %v2198_v23, %s1870_s15  ;;  %589 = vrot.lane.b32.xlu1 %v2198_v23, %s1869_s14 }
 0x159   : > { %685 = vrot.lane.b32.xlu0 %v2198_v23, %s1871_s19 }
 0x15a   : > { %v512_v24 = vpop.permute.xlu1 %511  ;;  %v388_v25 = vpop.permute.xlu2 %387 }
 0x15b   : > { %v398_v41 = vpop.permute.xlu0 %397 }
 0x15c   : > { %v436_v42 = vmax.f32 %v2059_v35, %v398_v41 }
 0x15e   : > { %v500_v44 = vmax.f32 %v436_v42, %v462_v14 }
 0x160   : > { %v2210_v26 = vmax.f32 %v500_v44, %v526_v3 }
 0x162   : > { %605 = vrot.lane.b32.xlu0 %v2210_v26, %s1869_s14  ;;  %701 = vrot.lane.b32.xlu2 %v2210_v26, %s1871_s19  ;;  %v400_v27 = vpop.permute.xlu1 %399  ;;  %v452_v46 = vpop.permute.xlu2 %451 }
 0x163   : > { %653 = vrot.lane.b32.xlu1 %v2210_v26, %s1870_s15  ;;  %v448_v47 = vpop.permute.xlu0 %447  ;;  %v437_v29 = vmax.f32 %v2075_v37, %v400_v27 }
 0x164   : > { %v493_v49 = vmax.f32 %v429_v45, %v448_v47 }
 0x165   : > { %v501_v54 = vmax.f32 %v437_v29, %v464_v9  ;;  %v431_v9 = vmax.f32 %v2099_v40, %v388_v25 }
 0x166   : > { %v2221_v28 = vmax.f32 %v493_v49, %v512_v24 }
 0x167   : > { %v495_v10 = vmax.f32 %v431_v9, %v452_v46 }
 0x16a   : > { %639 = vrot.lane.b32.xlu0 %v2221_v28, %s1870_s15  ;;  %591 = vrot.lane.b32.xlu2 %v2221_v28, %s1869_s14  ;;  %v386_v50 = vpop.permute.xlu1 %385  ;;  %v532_v51 = vpop.permute.xlu2 %531 }
 0x16b   : > { %687 = vrot.lane.b32.xlu1 %v2221_v28, %s1871_s19  ;;  %v528_v53 = vpop.permute.xlu0 %527  ;;  %v430_v55 = vmax.f32 %v2083_v38, %v386_v50 }
 0x16c   : > { %v2231_v30 = vmax.f32 %v501_v54, %v528_v53 }
 0x172   : > { %703 = vrot.lane.b32.xlu0 %v2231_v30, %s1871_s19  ;;  %655 = vrot.lane.b32.xlu2 %v2231_v30, %s1870_s15  ;;  %v450_v31 = vpop.permute.xlu1 %449  ;;  %v390_v56 = vpop.permute.xlu2 %389 }
 0x173   : > { %607 = vrot.lane.b32.xlu1 %v2231_v30, %s1869_s14  ;;  %v466_v57 = vpop.permute.xlu0 %465  ;;  %v494_v59 = vmax.f32 %v430_v55, %v450_v31  ;;  %v432_v20 = vmax.f32 %v2121_v48, %v390_v56 }
 0x174   : > { %v502_v3 = vmax.f32 %v438_v2, %v466_v57 }
 0x175   : > { %v2240_v60 = vmax.f32 %v494_v59, %v514_v15 }
 0x17a   : > { %593 = vrot.lane.b32.xlu0 %v2240_v60, %s1869_s14  ;;  %689 = vrot.lane.b32.xlu2 %v2240_v60, %s1871_s19  ;;  %v530_v61 = vpop.permute.xlu1 %529  ;;  %v470_v62 = vpop.permute.xlu2 %469 }
 0x17b   : > { %641 = vrot.lane.b32.xlu1 %v2240_v60, %s1870_s15  ;;  %v516_v0 = vpop.permute.xlu0 %515  ;;  %v2249_v4 = vmax.f32 %v502_v3, %v530_v61 }
 0x17c   : > { %v2258_v12 = vmax.f32 %v495_v10, %v516_v0 }
 0x182   : > { %657 = vrot.lane.b32.xlu0 %v2249_v4, %s1870_s15  ;;  %609 = vrot.lane.b32.xlu2 %v2249_v4, %s1869_s14  ;;  %v468_v6 = vpop.permute.xlu1 %467  ;;  %v520_v7 = vpop.permute.xlu2 %519 }
 0x183   : > { %705 = vrot.lane.b32.xlu1 %v2249_v4, %s1871_s19  ;;  %v404_v8 = vpop.permute.xlu0 %403 }
 0x184   : > { %v439_v13 = vmax.f32 %v2113_v43, %v404_v8 }
 0x186   : > { %v503_v18 = vmax.f32 %v439_v13, %v468_v6 }
 0x188   : > { %v2267_v19 = vmax.f32 %v503_v18, %v532_v51 }
 0x18a   : > { %691 = vrot.lane.b32.xlu0 %v2258_v12, %s1871_s19  ;;  %643 = vrot.lane.b32.xlu2 %v2258_v12, %s1870_s15  ;;  %v518_v14 = vpop.permute.xlu1 %517  ;;  %v408_v15 = vpop.permute.xlu2 %407 }
 0x18b   : > { %595 = vrot.lane.b32.xlu1 %v2258_v12, %s1869_s14  ;;  %v454_v16 = vpop.permute.xlu0 %453  ;;  %v441_v55 = vmax.f32 %v2145_v63, %v408_v15 }
 0x18c   : > { %v496_v25 = vmax.f32 %v432_v20, %v454_v16 }
 0x18e   : > { %v2276_v41 = vmax.f32 %v496_v25, %v518_v14 }
 0x192   : > { %611 = vrot.lane.b32.xlu0 %v2267_v19, %s1869_s14  ;;  %707 = vrot.lane.b32.xlu2 %v2267_v19, %s1871_s19  ;;  %v406_v21 = vpop.permute.xlu1 %405  ;;  %v458_v22 = vpop.permute.xlu2 %457 }
 0x193   : > { %659 = vrot.lane.b32.xlu1 %v2267_v19, %s1870_s15  ;;  %v534_v24 = vpop.permute.xlu0 %533  ;;  %v440_v42 = vmax.f32 %v2129_v52, %v406_v21 }
 0x195   : > { %v504_v46 = vmax.f32 %v440_v42, %v470_v62 }
 0x197   : > { %v2285_v47 = vmax.f32 %v504_v46, %v534_v24 }
 0x19a   : > { %645 = vrot.lane.b32.xlu0 %v2276_v41, %s1870_s15  ;;  %597 = vrot.lane.b32.xlu2 %v2276_v41, %s1869_s14  ;;  %v456_v44 = vpop.permute.xlu1 %455  ;;  %v538_v45 = vpop.permute.xlu2 %537 }
 0x19b   : > { %693 = vrot.lane.b32.xlu1 %v2276_v41, %s1871_s19  ;;  %v392_v27 = vpop.permute.xlu0 %391 }
 0x19c   : > { %v433_v49 = vmax.f32 %v2137_v58, %v392_v27 }
 0x19e   : > { %v497_v53 = vmax.f32 %v433_v49, %v456_v44 }
 0x1a0   : > { %v2294_v54 = vmax.f32 %v497_v53, %v520_v7 }
 0x1a2   : > { %709 = vrot.lane.b32.xlu0 %v2285_v47, %s1871_s19  ;;  %661 = vrot.lane.b32.xlu2 %v2285_v47, %s1870_s15  ;;  %v536_v29 = vpop.permute.xlu1 %535  ;;  %v684_v50 = vpop.permute.xlu2 %683 }
 0x1a3   : > { %613 = vrot.lane.b32.xlu1 %v2285_v47, %s1869_s14  ;;  %v472_v51 = vpop.permute.xlu0 %471 }
 0x1a4   : > { %v505_v59 = vmax.f32 %v441_v55, %v472_v51 }
 0x1a6   : > { %v2303_v61 = vmax.f32 %v505_v59, %v536_v29 }
 0x1aa   : > { %599 = vrot.lane.b32.xlu0 %v2294_v54, %s1869_s14  ;;  %695 = vrot.lane.b32.xlu2 %v2294_v54, %s1871_s19  ;;  %v604_v31 = vpop.permute.xlu2 %603  ;;  %v394_v56 = vpop.permute.xlu1 %393 }
 0x1ab   : > { %647 = vrot.lane.b32.xlu1 %v2294_v54, %s1870_s15  ;;  %v522_v57 = vpop.permute.xlu0 %521  ;;  %v434_v62 = vmax.f32 %v2155_v1, %v394_v56  ;;  %v740_v25 = vsel %vm731_vm1, %v2187_v17, %v604_v31 }
 0x1ad   : > { %v498_v6 = vmax.f32 %v434_v62, %v458_v22 }
 0x1af   : > { %v2312_v7 = vmax.f32 %v498_v6, %v522_v57 }
 0x1b2   : > { %663 = vrot.lane.b32.xlu0 %v2303_v61, %s1870_s15  ;;  %615 = vrot.lane.b32.xlu2 %v2303_v61, %s1869_s14  ;;  %v638_v0 = vpop.permute.xlu2 %637  ;;  %v474_v2 = vpop.permute.xlu1 %473 }
 0x1b3   : > { %711 = vrot.lane.b32.xlu1 %v2303_v61, %s1871_s19  ;;  %v410_v3 = vpop.permute.xlu0 %409 }
 0x1b4   : > { %v442_v8 = vmax.f32 %v2165_v5, %v410_v3  ;;  %v274_v3 = vpop.f32.mrf.mxu2 }
 0x1b6   : > { %v506_v13 = vmax.f32 %v442_v8, %v474_v2 }
 0x1b8   : > { %v2326_v21 = vmax.f32 %v506_v13, %v538_v45 }
 0x1ba   : > { %697 = vrot.lane.b32.xlu0 %v2312_v7, %s1871_s19  ;;  %649 = vrot.lane.b32.xlu2 %v2312_v7, %s1870_s15  ;;  %v636_v9 = vpop.permute.xlu1 %635 }
 0x1bb   : > { %601 = vrot.lane.b32.xlu1 %v2312_v7, %s1869_s14  ;;  %v588_v10 = vpop.permute.xlu0 %587 }
 0x1bc   : > { %v732_v14 = vsel %vm731_vm1, %v2176_v11, %v588_v10  ;;  %v702_v15 = vpop.permute.xlu2 %701 }
 0x1bd   : > { %v749_v16 = vsel %vm748_vm0, %v732_v14, %v636_v9 }
 0x1be   : > { %v766_v18 = vsel %vm765_vm2, %v749_v16, %v684_v50  ;;  %v250_v50 = vpop.f32.mrf.mxu0 }
 0x1bf   : > { %v782_v20 = vsub.f32 %v2041_v32, %v766_v18 }
 0x1c1   : > { %v798_v22 = vmul.f32 1.442695, %v782_v20 }
 0x1c2   : > { %713 = vrot.lane.b32.xlu2 %v2326_v21, %s1871_s19  ;;  %617 = vrot.lane.b32.xlu0 %v2326_v21, %s1869_s14  ;;  %v700_v24 = vpop.permute.xlu1 %699 }
 0x1c3   : > { %1700 = vpow2.f32 %v798_v22  ;;  %665 = vrot.lane.b32.xlu1 %v2326_v21, %s1870_s15  ;;  %v652_v11 = vpop.permute.xlu0 %651 }
 0x1c4   : > { %v592_v42 = vpop.permute.xlu2 %591  ;;  %v757_v32 = vsel %vm748_vm0, %v740_v25, %v652_v11 }
 0x1c5   : > { %v774_v44 = vsel %vm765_vm2, %v757_v32, %v700_v24 }
 0x1c6   : > { %v790_v46 = vsub.f32 %v2049_v33, %v774_v44  ;;  %v253_v20 = vpop.f32.mrf.mxu0 }
 0x1c8   : > { %v814_v53 = vmul.f32 1.442695, %v790_v46 }
 0x1c9   : > { %v2338_v45 = vpop.eup %1700 }
 0x1ca   : > { %1006 = vrot.lane.b32.xlu2 %v2338_v45, %s1870_s15  ;;  %862 = vrot.lane.b32.xlu0 %v2338_v45, %s1871_s19  ;;  %v590_v27 = vpop.permute.xlu1 %589  ;;  %v2353_v55 = vmul.f32 %v2338_v45, %v250_v50  ;;  %1702 = vpow2.f32 %v814_v53 }
 0x1cb   : > { %1134 = vrot.lane.b32.xlu1 %v2338_v45, %s1869_s14  ;;  %v686_v17 = vpop.permute.xlu0 %685  ;;  %v733_v49 = vsel %vm731_vm1, %v2198_v23, %v590_v27 }
 0x1cc   : > { %v2349_v29 = vpop.permute.xlu2 %655  ;;  %v750_v51 = vsel %vm748_vm0, %v733_v49, %v638_v0  ;;  %v277_v49 = vpop.f32.mrf.mxu2 }
 0x1cd   : > { %v767_v31 = vsel %vm765_vm2, %v750_v51, %v686_v17 }
 0x1ce   : > { %v783_v33 = vsub.f32 %v2057_v34, %v767_v31 }
 0x1d0   : > { %v800_v59 = vmul.f32 1.442695, %v783_v33  ;;  %v2365_v62 = vpop.eup %1702 }
 0x1d1   : > { %v2379_v9 = vmul.f32 %v2365_v62, %v274_v3 }
 0x1d2   : > { %1198 = vrot.lane.b32.xlu2 %v2353_v55, %s1869_s14  ;;  %1070 = vrot.lane.b32.xlu0 %v2353_v55, %s1870_s15  ;;  %1704 = vpow2.f32 %v800_v59 }
 0x1d3   : > { %942 = vrot.lane.b32.xlu1 %v2353_v55, %s1871_s19 }
 0x1d4   : > { %v606_v23 = vpop.permute.xlu0 %605  ;;  %v2363_v56 = vpop.permute.xlu2 %689 }
 0x1d5   : > { %v654_v57 = vpop.permute.xlu1 %653  ;;  %v741_v0 = vsel %vm731_vm1, %v2210_v26, %v606_v23 }
 0x1d6   : > { %v758_v8 = vsel %vm748_vm0, %v741_v0, %v654_v57 }
 0x1d7   : > { %v775_v10 = vsel %vm765_vm2, %v758_v8, %v702_v15 }
 0x1d8   : > { %v2382_v13 = vpop.eup %1704  ;;  %v791_v26 = vsub.f32 %v2059_v35, %v775_v10  ;;  %v734_v35 = vsel %vm731_vm1, %v2221_v28, %v592_v42 }
 0x1d9   : > { %v2394_v15 = vmul.f32 %v2382_v13, %v253_v20 }
 0x1da   : > { %878 = vrot.lane.b32.xlu2 %v2365_v62, %s1871_s19  ;;  %1150 = vrot.lane.b32.xlu0 %v2365_v62, %s1869_s14  ;;  %v816_v22 = vmul.f32 1.442695, %v791_v26 }
 0x1db   : > { %1022 = vrot.lane.b32.xlu1 %v2365_v62, %s1870_s15 }
 0x1dc   : > { %v640_v34 = vpop.permute.xlu0 %639  ;;  %v2375_v2 = vpop.permute.xlu2 %609  ;;  %1706 = vpow2.f32 %v816_v22 }
 0x1dd   : > { %v688_v6 = vpop.permute.xlu1 %687  ;;  %v751_v25 = vsel %vm748_vm0, %v734_v35, %v640_v34 }
 0x1de   : > { %v768_v44 = vsel %vm765_vm2, %v751_v25, %v688_v6 }
 0x1df   : > { %v784_v46 = vsub.f32 %v2067_v36, %v768_v44  ;;  %v280_v44 = vpop.f32.mrf.mxu2 }
 0x1e1   : > { %v802_v50 = vmul.f32 1.442695, %v784_v46 }
 0x1e2   : > { %1086 = vrot.lane.b32.xlu2 %v2379_v9, %s1870_s15  ;;  %958 = vrot.lane.b32.xlu0 %v2379_v9, %s1871_s19  ;;  %v2408_v27 = vpop.eup %1706 }
 0x1e3   : > { %864 = vrot.lane.b32.xlu1 %v2382_v13, %s1871_s19  ;;  %v2420_v51 = vmul.f32 %v2408_v27, %v277_v49  ;;  %1708 = vpow2.f32 %v802_v50 }
 0x1e4   : > { %v704_v14 = vpop.permute.xlu0 %703  ;;  %v2391_v16 = vpop.permute.xlu2 %643 }
 0x1e5   : > { %v608_v18 = vpop.permute.xlu1 %607 }
 0x1e6   : > { %v742_v53 = vsel %vm731_vm1, %v2231_v30, %v608_v18 }
 0x1e7   : > { %v759_v33 = vsel %vm748_vm0, %v742_v53, %v2349_v29  ;;  %v256_v29 = vpop.f32.mrf.mxu0 }
 0x1e8   : > { %v776_v57 = vsel %vm765_vm2, %v759_v33, %v704_v14 }
 0x1e9   : > { %v2435_v30 = vpop.eup %1708  ;;  %v792_v59 = vsub.f32 %v2075_v37, %v776_v57 }
 0x1ea   : > { %1136 = vrot.lane.b32.xlu2 %v2382_v13, %s1869_s14  ;;  %1008 = vrot.lane.b32.xlu0 %v2382_v13, %s1870_s15  ;;  %v2449_v8 = vmul.f32 %v2435_v30, %v256_v29 }
 0x1eb   : > { %1072 = vrot.lane.b32.xlu1 %v2394_v15, %s1870_s15  ;;  %v818_v6 = vmul.f32 1.442695, %v792_v59 }
 0x1ec   : > { %v594_v24 = vpop.permute.xlu0 %593  ;;  %v2404_v11 = vpop.permute.xlu2 %707 }
 0x1ed   : > { %v642_v32 = vpop.permute.xlu1 %641  ;;  %v735_v10 = vsel %vm731_vm1, %v2240_v60, %v594_v24  ;;  %1710 = vpow2.f32 %v818_v6 }
 0x1ee   : > { %v752_v18 = vsel %vm748_vm0, %v735_v10, %v642_v32 }
 0x1ef   : > { %v769_v35 = vsel %vm765_vm2, %v752_v18, %v2363_v56 }
 0x1f2   : > { %1200 = vrot.lane.b32.xlu0 %v2394_v15, %s1869_s14  ;;  %944 = vrot.lane.b32.xlu2 %v2394_v15, %s1871_s19 }
 0x1f3   : > { %1152 = vrot.lane.b32.xlu1 %v2408_v27, %s1869_s14  ;;  %v2468_v24 = vpop.eup %1710 }
 0x1f4   : > { %v658_v28 = vpop.permute.xlu0 %657  ;;  %v598_v42 = vpop.permute.xlu2 %597  ;;  %v2481_v50 = vmul.f32 %v2468_v24, %v280_v44 }
 0x1f5   : > { %v2417_v17 = vpop.permute.xlu1 %705  ;;  %v737_v37 = vsel %vm731_vm1, %v2276_v41, %v598_v42  ;;  %v785_v41 = vsub.f32 %v2083_v38, %v769_v35  ;;  %v743_v38 = vsel %vm731_vm1, %v2249_v4, %v2375_v2 }
 0x1f6   : > { %v760_v33 = vsel %vm748_vm0, %v743_v38, %v658_v28 }
 0x1f7   : > { %v804_v42 = vmul.f32 1.442695, %v785_v41  ;;  %v777_v10 = vsel %vm765_vm2, %v760_v33, %v2417_v17 }
 0x1f8   : > { %v793_v4 = vsub.f32 %v2091_v39, %v777_v10 }
 0x1f9   : > { %1712 = vpow2.f32 %v804_v42  ;;  %v283_v42 = vpop.f32.mrf.mxu2 }
 0x1fa   : > { %880 = vrot.lane.b32.xlu0 %v2408_v27, %s1871_s19  ;;  %1024 = vrot.lane.b32.xlu2 %v2408_v27, %s1870_s15 }
 0x1fb   : > { %960 = vrot.lane.b32.xlu1 %v2420_v51, %s1871_s19 }
 0x1fc   : > { %v2430_v36 = vpop.permute.xlu0 %691  ;;  %v662_v31 = vpop.permute.xlu2 %661 }
 0x1fd   : > { %v596_v23 = vpop.permute.xlu1 %595 }
 0x202   : > { %1088 = vrot.lane.b32.xlu0 %v2420_v51, %s1870_s15  ;;  %866 = vrot.lane.b32.xlu2 %v2435_v30, %s1871_s19 }
 0x203   : > { %1010 = vrot.lane.b32.xlu1 %v2435_v30, %s1870_s15 }
 0x204   : > { %v2444_v0 = vpop.permute.xlu0 %611  ;;  %v696_v34 = vpop.permute.xlu2 %695 }
 0x205   : > { %v2446_v3 = vpop.permute.xlu1 %659 }
 0x20a   : > { %1138 = vrot.lane.b32.xlu0 %v2435_v30, %s1869_s14  ;;  %1074 = vrot.lane.b32.xlu2 %v2449_v8, %s1870_s15 }
 0x20b   : > { %1202 = vrot.lane.b32.xlu1 %v2449_v8, %s1869_s14 }
 0x20c   : > { %v646_v26 = vpop.permute.xlu0 %645  ;;  %v616_v14 = vpop.permute.xlu2 %615 }
 0x20d   : > { %v754_v20 = vsel %vm748_vm0, %v737_v37, %v646_v26  ;;  %v694_v60 = vpop.permute.xlu1 %693  ;;  %v2504_v37 = vpop.eup %1712  ;;  %v746_v2 = vsel %vm731_vm1, %v2303_v61, %v616_v14 }
 0x20e   : > { %v2464_v22 = vsel %vm765_vm2, %v754_v20, %v694_v60  ;;  %v820_v60 = vmul.f32 1.442695, %v793_v4 }
 0x210   : > { %1714 = vpow2.f32 %v820_v60 }
 0x212   : > { %1154 = vrot.lane.b32.xlu2 %v2468_v24, %s1869_s14  ;;  %946 = vrot.lane.b32.xlu0 %v2449_v8, %s1871_s19 }
 0x213   : > { %882 = vrot.lane.b32.xlu1 %v2468_v24, %s1871_s19 }
 0x214   : > { %v710_v25 = vpop.permute.xlu0 %709  ;;  %v650_v32 = vpop.permute.xlu2 %649 }
 0x215   : > { %v614_v46 = vpop.permute.xlu1 %613 }
 0x216   : > { %v745_v56 = vsel %vm731_vm1, %v2285_v47, %v614_v46  ;;  %v2543_v46 = vpop.eup %1714 }
 0x217   : > { %v762_v49 = vsel %vm748_vm0, %v745_v56, %v662_v31  ;;  %v744_v56 = vsel %vm731_vm1, %v2267_v19, %v2444_v0  ;;  %v2565_v33 = vmul.f32 %v2543_v46, %v283_v42 }
 0x218   : > { %v2484_v53 = vsel %vm765_vm2, %v762_v49, %v710_v25 }
 0x21a   : > { %962 = vrot.lane.b32.xlu2 %v2481_v50, %s1871_s19  ;;  %1026 = vrot.lane.b32.xlu0 %v2468_v24, %s1870_s15 }
 0x21b   : > { %1090 = vrot.lane.b32.xlu1 %v2481_v50, %s1870_s15 }
 0x21c   : > { %v600_v47 = vpop.permute.xlu0 %599  ;;  %v714_v31 = vpop.permute.xlu2 %713 }
 0x21d   : > { %v738_v57 = vsel %vm731_vm1, %v2294_v54, %v600_v47  ;;  %v648_v59 = vpop.permute.xlu1 %647  ;;  %v736_v54 = vsel %vm731_vm1, %v2258_v12, %v596_v23 }
 0x21e   : > { %v755_v29 = vsel %vm748_vm0, %v738_v57, %v648_v59  ;;  %v753_v20 = vsel %vm748_vm0, %v736_v54, %v2391_v16 }
 0x21f   : > { %v2500_v6 = vsel %vm765_vm2, %v755_v29, %v696_v34  ;;  %v259_v34 = vpop.f32.mrf.mxu0  ;;  %v770_v23 = vsel %vm765_vm2, %v753_v20, %v2430_v36  ;;  %v787_v20 = vsub.f32 %v2121_v48, %v2464_v22 }
 0x220   : > { %v2524_v12 = vmul.f32 %v2504_v37, %v259_v34  ;;  %v786_v61 = vsub.f32 %v2099_v40, %v770_v23  ;;  %v761_v40 = vsel %vm748_vm0, %v744_v56, %v2446_v3 }
 0x221   : > { %v778_v38 = vsel %vm765_vm2, %v761_v40, %v2404_v11 }
 0x222   : > { %1012 = vrot.lane.b32.xlu2 %v2504_v37, %s1870_s15  ;;  %868 = vrot.lane.b32.xlu0 %v2504_v37, %s1871_s19  ;;  %v806_v25 = vmul.f32 1.442695, %v786_v61  ;;  %v794_v3 = vsub.f32 %v2113_v43, %v778_v38 }
 0x223   : > { %1140 = vrot.lane.b32.xlu1 %v2504_v37, %s1869_s14 }
 0x224   : > { %v664_v28 = vpop.permute.xlu0 %663  ;;  %v1007_v17 = vpop.permute.xlu2 %1006  ;;  %1716 = vpow2.f32 %v806_v25  ;;  %v822_v29 = vmul.f32 1.442695, %v794_v3 }
 0x225   : > { %v763_v26 = vsel %vm748_vm0, %v746_v2, %v664_v28  ;;  %v712_v18 = vpop.permute.xlu1 %711 }
 0x226   : > { %v2521_v39 = vsel %vm765_vm2, %v763_v26, %v712_v18  ;;  %1718 = vpow2.f32 %v822_v29 }
 0x227   : > { %v262_v10 = vpop.f32.mrf.mxu0 }
 0x22a   : > { %1204 = vrot.lane.b32.xlu2 %v2524_v12, %s1869_s14  ;;  %1076 = vrot.lane.b32.xlu0 %v2524_v12, %s1870_s15  ;;  %v2567_v57 = vpop.eup %1716 }
 0x22b   : > { %948 = vrot.lane.b32.xlu1 %v2524_v12, %s1871_s19  ;;  %v2580_v43 = vmul.f32 %v2567_v57, %v262_v10 }
 0x22c   : > { %v698_v16 = vpop.permute.xlu0 %697  ;;  %v2535_v14 = vpop.permute.xlu2 %1198 }
 0x22d   : > { %v602_v35 = vpop.permute.xlu1 %601 }
 0x22e   : > { %v739_v41 = vsel %vm731_vm1, %v2312_v7, %v602_v35 }
 0x22f   : > { %v756_v36 = vsel %vm748_vm0, %v739_v41, %v650_v32 }
 0x230   : > { %v2541_v44 = vsel %vm765_vm2, %v756_v36, %v698_v16 }
 0x232   : > { %884 = vrot.lane.b32.xlu2 %v2543_v46, %s1871_s19  ;;  %1156 = vrot.lane.b32.xlu0 %v2543_v46, %s1869_s14 }
 0x233   : > { %1028 = vrot.lane.b32.xlu1 %v2543_v46, %s1870_s15 }
 0x234   : > { %v618_v7 = vpop.permute.xlu0 %617  ;;  %v879_v32 = vpop.permute.xlu2 %878 }
 0x235   : > { %v747_v49 = vsel %vm731_vm1, %v2326_v21, %v618_v7  ;;  %v666_v19 = vpop.permute.xlu1 %665  ;;  %v918_v60 = vadd.f32 %v2365_v62, %v879_v32  ;;  %v808_v7 = vmul.f32 1.442695, %v787_v20 }
 0x236   : > { %v764_v0 = vsel %vm748_vm0, %v747_v49, %v666_v19 }
 0x237   : > { %v2562_v47 = vsel %vm765_vm2, %v764_v0, %v714_v31 }
 0x23a   : > { %1092 = vrot.lane.b32.xlu2 %v2565_v33, %s1870_s15  ;;  %964 = vrot.lane.b32.xlu0 %v2565_v33, %s1871_s19 }
 0x23b   : > { %870 = vrot.lane.b32.xlu1 %v2567_v57, %s1871_s19 }
 0x23c   : > { %v863_v21 = vpop.permute.xlu0 %862  ;;  %v2576_v11 = vpop.permute.xlu2 %1086 }
 0x23d   : > { %v910_v31 = vadd.f32 %v2338_v45, %v863_v21  ;;  %v1135_v59 = vpop.permute.xlu1 %1134 }
 0x23f   : > { %v1054_v4 = vadd.f32 %v1007_v17, %v910_v31  ;;  %v2592_v17 = vpop.eup %1718 }
 0x241   : > { %v1182_v54 = vadd.f32 %v1135_v59, %v1054_v4 }
 0x242   : > { %1142 = vrot.lane.b32.xlu2 %v2567_v57, %s1869_s14  ;;  %1014 = vrot.lane.b32.xlu0 %v2567_v57, %s1870_s15 }
 0x243   : > { %1720 = vrcp.f32 %v1182_v54  ;;  %1078 = vrot.lane.b32.xlu1 %v2580_v43, %s1870_s15  ;;  %v1271_v35 = vand.u32 2147483647, %v1182_v54  ;;  %v1273_v41 = vand.u32 2147483648, %v1182_v54  ;;  %vm1267_vm4 = vweird.f32 %v1182_v54 }
 0x244   : > { %v2588_v45 = vpop.permute.xlu2 %1136  ;;  %v1071_v2 = vpop.permute.xlu0 %1070  ;;  %1722 = vpow2.f32 %v808_v7 }
 0x245   : > { %v943_v28 = vpop.permute.xlu1 %942  ;;  %v1274_v32 = vor.u32 1.1754944e-38, %v1273_v41  ;;  %vm1272_vm6 = vcmp.eq.f32.partialorder %v1271_v35, 8.507059e+37 }
 0x246   : > { %v990_v18 = vadd.f32 %v943_v28, %v2353_v55  ;;  %v286_v55 = vpop.f32.mrf.mxu2 }
 0x247   : > { %v2607_v48 = vmul.f32 %v2592_v17, %v286_v55 }
 0x248   : > { %v1118_v56 = vadd.f32 %v1071_v2, %v990_v18 }
 0x249   : > { %v1721_v34 = vpop.eup %1720 }
 0x24a   : > { %v1263_v26 = vmul.f32 %v1721_v34, %v1182_v54  ;;  %886 = vrot.lane.b32.xlu0 %v2592_v17, %s1871_s19  ;;  %950 = vrot.lane.b32.xlu2 %v2580_v43, %s1871_s19  ;;  %vm1268_vm3 = vweird.f32 %v1721_v34  ;;  %v1246_v49 = vadd.f32 %v2535_v14, %v1118_v56  ;;  %v795_v14 = vsub.f32 %v2129_v52, %v2484_v53  ;;  %v2631_v10 = vpop.eup %1722  ;;  %v265_v54 = vpop.f32.mrf.mxu0 }
 0x24b   : > { %1158 = vrot.lane.b32.xlu1 %v2592_v17, %s1869_s14  ;;  %vm1269_vm5 = vmor %vm1267_vm4, %vm1268_vm3 }
 0x24c   : > { %v1264_v23 = vsub.f32 1.0, %v1263_v26  ;;  %v1151_v61 = vpop.permute.xlu0 %1150  ;;  %v2604_v16 = vpop.permute.xlu2 %944  ;;  %v824_v29 = vmul.f32 1.442695, %v795_v14 }
 0x24d   : > { %v1023_v36 = vpop.permute.xlu1 %1022 }
 0x24e   : > { %v1265_v25 = vmul.f32 %v1721_v34, %v1264_v23  ;;  %v1062_v40 = vadd.f32 %v1023_v36, %v918_v60  ;;  %1724 = vpow2.f32 %v824_v29  ;;  %v289_v60 = vpop.f32.mrf.mxu2 }
 0x250   : > { %v1266_v22 = vadd.f32 %v1721_v34, %v1265_v25  ;;  %v2609_v62 = vadd.f32 %v1151_v61, %v1062_v40 }
 0x252   : > { %v1270_v42 = vsel %vm1269_vm5, %v1721_v34, %v1266_v22  ;;  %1094 = vrot.lane.b32.xlu0 %v2607_v48, %s1870_s15  ;;  %1030 = vrot.lane.b32.xlu2 %v2592_v17, %s1870_s15  ;;  %v2642_v34 = vmul.f32 %v2631_v10, %v265_v54 }
 0x253   : > { %v1275_v19 = vsel %vm1272_vm6, %v1274_v32, %v1270_v42  ;;  %966 = vrot.lane.b32.xlu1 %v2607_v48, %s1871_s19 }
 0x254   : > { %v1486_v0 = vmul.f32 %v1275_v19, %v1246_v49  ;;  %v959_v38 = vpop.permute.xlu0 %958  ;;  %v1025_v3 = vpop.permute.xlu2 %1024 }
 0x255   : > { %v998_v21 = vadd.f32 %v959_v38, %v2379_v9  ;;  %v865_v31 = vpop.permute.xlu1 %864  ;;  %v2644_v26 = vpop.eup %1724 }
 0x256   : > { %1502 = vst.msk [vmem:[%s2619_s7] sm:$0xff] %vm731_vm1, %v1486_v0  ;;  %v911_v52 = vadd.f32 %v2382_v13, %v865_v31  ;;  %v788_v13 = vsub.f32 %v2137_v58, %v2500_v6  ;;  %v2657_v35 = vmul.f32 %v2644_v26, %v289_v60  ;;  %v991_v6 = vadd.f32 %v2604_v16, %v2394_v15 }
 0x257   : > { %v2629_v59 = vadd.f32 %v2576_v11, %v998_v21 }
 0x258   : > { %v810_v61 = vmul.f32 1.442695, %v788_v13 }
 0x25a   : > { %1144 = vrot.lane.b32.xlu0 %v2631_v10, %s1869_s14  ;;  %872 = vrot.lane.b32.xlu2 %v2631_v10, %s1871_s19 }
 0x25b   : > { %1016 = vrot.lane.b32.xlu1 %v2631_v10, %s1870_s15 }
 0x25c   : > { %v1009_v53 = vpop.permute.xlu0 %1008  ;;  %v867_v4 = vpop.permute.xlu2 %866 }
 0x25d   : > { %v1055_v11 = vadd.f32 %v1009_v53, %v911_v52  ;;  %v1073_v2 = vpop.permute.xlu1 %1072  ;;  %v268_v52 = vpop.f32.mrf.mxu0 }
 0x25e   : > { %v1119_v32 = vadd.f32 %v1073_v2, %v991_v6 }
 0x25f   : > { %v1183_v28 = vadd.f32 %v2588_v45, %v1055_v11 }
 0x261   : > { %1726 = vrcp.f32 %v1183_v28  ;;  %v1287_v58 = vand.u32 2147483648, %v1183_v28  ;;  %v1285_v25 = vand.u32 2147483647, %v1183_v28  ;;  %vm1281_vm8 = vweird.f32 %v1183_v28 }
 0x262   : > { %1080 = vrot.lane.b32.xlu2 %v2642_v34, %s1870_s15  ;;  %952 = vrot.lane.b32.xlu0 %v2642_v34, %s1871_s19  ;;  %1728 = vpow2.f32 %v810_v61  ;;  %v292_v61 = vpop.f32.mrf.mxu2 }
 0x263   : > { %888 = vrot.lane.b32.xlu1 %v2644_v26, %s1871_s19  ;;  %v1288_v49 = vor.u32 1.1754944e-38, %v1287_v58  ;;  %vm1286_vm10 = vcmp.eq.f32.partialorder %v1285_v25, 8.507059e+37 }
 0x264   : > { %v1201_v18 = vpop.permute.xlu0 %1200  ;;  %v2654_v45 = vpop.permute.xlu2 %1074 }
 0x265   : > { %v1153_v20 = vpop.permute.xlu1 %1152  ;;  %v1247_v0 = vadd.f32 %v1201_v18, %v1119_v32 }
 0x267   : > { %v1727_v23 = vpop.eup %1726 }
 0x268   : > { %v1277_v55 = vmul.f32 %v1727_v23, %v1183_v28  ;;  %vm1282_vm7 = vweird.f32 %v1727_v23  ;;  %v2670_v15 = vpop.eup %1728  ;;  %v912_v28 = vadd.f32 %v2435_v30, %v867_v4 }
 0x269   : > { %vm1283_vm9 = vmor %vm1281_vm8, %vm1282_vm7  ;;  %v2688_v2 = vmul.f32 %v2670_v15, %v268_v52 }
 0x26a   : > { %v1278_v41 = vsub.f32 1.0, %v1277_v55  ;;  %1160 = vrot.lane.b32.xlu2 %v2644_v26, %s1869_s14  ;;  %1032 = vrot.lane.b32.xlu0 %v2644_v26, %s1870_s15 }
 0x26b   : > { %1096 = vrot.lane.b32.xlu1 %v2657_v35, %s1870_s15 }
 0x26c   : > { %v1279_v36 = vmul.f32 %v1727_v23, %v1278_v41  ;;  %v881_v56 = vpop.permute.xlu0 %880  ;;  %v2667_v40 = vpop.permute.xlu2 %1154 }
 0x26d   : > { %v919_v7 = vadd.f32 %v2408_v27, %v881_v56  ;;  %v961_v22 = vpop.permute.xlu1 %960  ;;  %v796_v27 = vsub.f32 %v2145_v63, %v2521_v39  ;;  %v789_v39 = vsub.f32 %v2155_v1, %v2541_v44 }
 0x26e   : > { %v1280_v42 = vadd.f32 %v1727_v23, %v1279_v36 }
 0x26f   : > { %v1063_v19 = vadd.f32 %v1025_v3, %v919_v7  ;;  %v999_v3 = vadd.f32 %v961_v22, %v2420_v51  ;;  %v826_v11 = vmul.f32 1.442695, %v796_v27  ;;  %v812_v30 = vmul.f32 1.442695, %v789_v39  ;;  %v271_v27 = vpop.f32.mrf.mxu0 }
 0x270   : > { %v1284_v14 = vsel %vm1283_vm9, %v1727_v23, %v1280_v42 }
 0x271   : > { %v1289_v16 = vsel %vm1286_vm10, %v1288_v49, %v1284_v14  ;;  %v2672_v38 = vadd.f32 %v1153_v20, %v1063_v19  ;;  %1730 = vpow2.f32 %v826_v11 }
 0x272   : > { %v1487_v21 = vmul.f32 %v1289_v16, %v1247_v0  ;;  %968 = vrot.lane.b32.xlu2 %v2657_v35, %s1871_s19  ;;  %874 = vrot.lane.b32.xlu0 %v2670_v15, %s1871_s19 }
 0x273   : > { %1146 = vrot.lane.b32.xlu1 %v2670_v15, %s1869_s14  ;;  %vm1393_vm9 = vweird.f32 %v2672_v38 }
 0x274   : > { %1503 = vst.msk [vmem:[%s2619_s7 + $0x8] sm:$0xff] %vm731_vm1, %v1487_v21  ;;  %v1089_v31 = vpop.permute.xlu0 %1088  ;;  %v963_v29 = vpop.permute.xlu2 %962 }
 0x275   : > { %v2685_v53 = vadd.f32 %v1089_v31, %v999_v3  ;;  %v1011_v54 = vpop.permute.xlu1 %1010  ;;  %v1000_v49 = vadd.f32 %v963_v29, %v2481_v50 }
 0x276   : > { %v1056_v63 = vadd.f32 %v1011_v54, %v912_v28 }
 0x277   : > { %v2699_v4 = vpop.eup %1730 }
 0x278   : > { %v2711_v6 = vmul.f32 %v2699_v4, %v292_v61 }
 0x27a   : > { %1018 = vrot.lane.b32.xlu2 %v2670_v15, %s1870_s15  ;;  %1082 = vrot.lane.b32.xlu0 %v2688_v2, %s1870_s15 }
 0x27b   : > { %954 = vrot.lane.b32.xlu1 %v2688_v2, %s1871_s19 }
 0x27c   : > { %v1139_v13 = vpop.permute.xlu0 %1138  ;;  %v1013_v18 = vpop.permute.xlu2 %1012 }
 0x27d   : > { %v1184_v20 = vadd.f32 %v1139_v13, %v1056_v63  ;;  %v1203_v60 = vpop.permute.xlu1 %1202 }
 0x27f   : > { %1732 = vrcp.f32 %v1184_v20  ;;  %v1301_v25 = vand.u32 2147483648, %v1184_v20  ;;  %v1299_v22 = vand.u32 2147483647, %v1184_v20  ;;  %vm1295_vm12 = vweird.f32 %v1184_v20 }
 0x280   : > { %1734 = vpow2.f32 %v812_v30 }
 0x281   : > { %v1302_v0 = vor.u32 1.1754944e-38, %v1301_v25  ;;  %vm1300_vm14 = vcmp.eq.f32.partialorder %v1299_v22, 8.507059e+37 }
 0x282   : > { %890 = vrot.lane.b32.xlu2 %v2699_v4, %s1871_s19  ;;  %1162 = vrot.lane.b32.xlu0 %v2699_v4, %s1869_s14 }
 0x283   : > { %1034 = vrot.lane.b32.xlu1 %v2699_v4, %s1870_s15 }
 0x284   : > { %v947_v23 = vpop.permute.xlu0 %946  ;;  %v2707_v1 = vpop.permute.xlu2 %1204 }
 0x285   : > { %v1733_v44 = vpop.eup %1732  ;;  %v883_v55 = vpop.permute.xlu1 %882  ;;  %v992_v58 = vadd.f32 %v947_v23, %v2449_v8  ;;  %v797_v8 = vsub.f32 %v2165_v5, %v2562_v47 }
 0x286   : > { %v1291_v41 = vmul.f32 %v1733_v44, %v1184_v20  ;;  %v2713_v56 = vpop.eup %1734  ;;  %vm1296_vm11 = vweird.f32 %v1733_v44  ;;  %v920_v42 = vadd.f32 %v2468_v24, %v883_v55  ;;  %v295_v23 = vpop.f32.mrf.mxu2 }
 0x287   : > { %v1120_v32 = vadd.f32 %v2654_v45, %v992_v58  ;;  %vm1297_vm13 = vmor %vm1295_vm12, %vm1296_vm11  ;;  %v828_v24 = vmul.f32 1.442695, %v797_v8  ;;  %v2732_v54 = vmul.f32 %v2713_v56, %v271_v27 }
 0x288   : > { %v1292_v36 = vsub.f32 1.0, %v1291_v41 }
 0x289   : > { %v1248_v5 = vadd.f32 %v1203_v60, %v1120_v32  ;;  %1736 = vpow2.f32 %v828_v24 }
 0x28a   : > { %v1293_v7 = vmul.f32 %v1733_v44, %v1292_v36  ;;  %1098 = vrot.lane.b32.xlu2 %v2711_v6, %s1870_s15  ;;  %970 = vrot.lane.b32.xlu0 %v2711_v6, %s1871_s19 }
 0x28b   : > { %876 = vrot.lane.b32.xlu1 %v2713_v56, %s1871_s19 }
 0x28c   : > { %v1294_v19 = vadd.f32 %v1733_v44, %v1293_v7  ;;  %v1027_v14 = vpop.permute.xlu0 %1026  ;;  %v885_v45 = vpop.permute.xlu2 %884 }
 0x28d   : > { %v1091_v16 = vpop.permute.xlu1 %1090  ;;  %v1064_v21 = vadd.f32 %v1027_v14, %v920_v42  ;;  %v921_v41 = vadd.f32 %v2543_v46, %v885_v45 }
 0x28e   : > { %v1298_v3 = vsel %vm1297_vm13, %v1733_v44, %v1294_v19  ;;  %v2726_v47 = vadd.f32 %v1091_v16, %v1000_v49  ;;  %vm1379_vm13 = vweird.f32 %v2609_v62 }
 0x28f   : > { %v1303_v31 = vsel %vm1300_vm14, %v1302_v0, %v1298_v3  ;;  %v2729_v52 = vadd.f32 %v2667_v40, %v1064_v21  ;;  %v2743_v13 = vpop.eup %1736 }
 0x290   : > { %v1488_v29 = vmul.f32 %v1303_v31, %v1248_v5 }
 0x292   : > { %1504 = vst.msk [vmem:[%s2619_s7 + $0x10] sm:$0xff] %vm731_vm1, %v1488_v29  ;;  %1148 = vrot.lane.b32.xlu2 %v2713_v56, %s1869_s14  ;;  %1020 = vrot.lane.b32.xlu0 %v2713_v56, %s1870_s15 }
 0x293   : > { %1084 = vrot.lane.b32.xlu1 %v2732_v54, %s1870_s15 }
 0x294   : > { %v869_v11 = vpop.permute.xlu0 %868  ;;  %v1093_v28 = vpop.permute.xlu2 %1092 }
 0x295   : > { %v1141_v40 = vpop.permute.xlu1 %1140  ;;  %v913_v63 = vadd.f32 %v2504_v37, %v869_v11  ;;  %v2752_v37 = vmul.f32 %v2743_v13, %v295_v23 }
 0x297   : > { %v1057_v39 = vadd.f32 %v1013_v18, %v913_v63 }
 0x299   : > { %v1185_v20 = vadd.f32 %v1141_v40, %v1057_v39 }
 0x29a   : > { %892 = vrot.lane.b32.xlu0 %v2743_v13, %s1871_s19  ;;  %956 = vrot.lane.b32.xlu2 %v2732_v54, %s1871_s19 }
 0x29b   : > { %1738 = vrcp.f32 %v1185_v20  ;;  %1164 = vrot.lane.b32.xlu1 %v2743_v13, %s1869_s14  ;;  %v1313_v7 = vand.u32 2147483647, %v1185_v20  ;;  %v1315_v22 = vand.u32 2147483648, %v1185_v20  ;;  %vm1309_vm0 = vweird.f32 %v1185_v20 }
 0x29c   : > { %v1143_v60 = vpop.permute.xlu2 %1142  ;;  %v1077_v30 = vpop.permute.xlu0 %1076 }
 0x29d   : > { %v949_v44 = vpop.permute.xlu1 %948  ;;  %v1316_v14 = vor.u32 1.1754944e-38, %v1315_v22  ;;  %vm1314_vm3 = vcmp.eq.f32.partialorder %v1313_v7, 8.507059e+37 }
 0x29e   : > { %v993_v55 = vadd.f32 %v949_v44, %v2524_v12 }
 0x2a0   : > { %v1121_v12 = vadd.f32 %v1077_v30, %v993_v55 }
 0x2a1   : > { %v1739_v18 = vpop.eup %1738 }
 0x2a2   : > { %v1305_v61 = vmul.f32 %v1739_v18, %v1185_v20  ;;  %1100 = vrot.lane.b32.xlu0 %v2752_v37, %s1870_s15  ;;  %1036 = vrot.lane.b32.xlu2 %v2743_v13, %s1870_s15  ;;  %vm1310_vm15 = vweird.f32 %v1739_v18  ;;  %v1249_v46 = vadd.f32 %v2707_v1, %v1121_v12 }
 0x2a3   : > { %972 = vrot.lane.b32.xlu1 %v2752_v37, %s1871_s19  ;;  %vm1311_vm2 = vmor %vm1309_vm0, %vm1310_vm15 }
 0x2a4   : > { %v1306_v58 = vsub.f32 1.0, %v1305_v61  ;;  %v1157_v36 = vpop.permute.xlu0 %1156  ;;  %v951_v25 = vpop.permute.xlu2 %950 }
 0x2a5   : > { %v1029_v32 = vpop.permute.xlu1 %1028  ;;  %v994_v31 = vadd.f32 %v951_v25, %v2580_v43 }
 0x2a6   : > { %v1307_v8 = vmul.f32 %v1739_v18, %v1306_v58  ;;  %v1065_v42 = vadd.f32 %v1029_v32, %v921_v41 }
 0x2a8   : > { %v1308_v49 = vadd.f32 %v1739_v18, %v1307_v8  ;;  %v2762_v19 = vadd.f32 %v1157_v36, %v1065_v42 }
 0x2aa   : > { %v1312_v0 = vsel %vm1311_vm2, %v1739_v18, %v1308_v49  ;;  %1206 = vrot.lane.b32.xlu0 %v2580_v43, %s1869_s14  ;;  %1210 = vrot.lane.b32.xlu2 %v2688_v2, %s1869_s14 }
 0x2ab   : > { %v1317_v45 = vsel %vm1314_vm3, %v1316_v14, %v1312_v0  ;;  %1208 = vrot.lane.b32.xlu1 %v2642_v34, %s1869_s14 }
 0x2ac   : > { %v1489_v16 = vmul.f32 %v1317_v45, %v1249_v46  ;;  %v965_v21 = vpop.permute.xlu0 %964  ;;  %v1031_v27 = vpop.permute.xlu2 %1030 }
 0x2ad   : > { %v1001_v3 = vadd.f32 %v965_v21, %v2565_v33  ;;  %v871_v5 = vpop.permute.xlu1 %870 }
 0x2ae   : > { %1505 = vst.msk [vmem:[%s2619_s7 + $0x18] sm:$0xff] %vm731_vm1, %v1489_v16  ;;  %v914_v1 = vadd.f32 %v2567_v57, %v871_v5 }
 0x2af   : > { %v2774_v24 = vadd.f32 %v1093_v28, %v1001_v3 }
 0x2b2   : > { %1212 = vrot.lane.b32.xlu0 %v2732_v54, %s1869_s14  ;;  %1216 = vrot.lane.b32.xlu2 %v2420_v51, %s1869_s14 }
 0x2b3   : > { %1214 = vrot.lane.b32.xlu1 %v2379_v9, %s1869_s14 }
 0x2b4   : > { %v1015_v29 = vpop.permute.xlu0 %1014  ;;  %v873_v11 = vpop.permute.xlu2 %872 }
 0x2b5   : > { %v1058_v40 = vadd.f32 %v1015_v29, %v914_v1  ;;  %v1079_v63 = vpop.permute.xlu1 %1078 }
 0x2b6   : > { %v2784_v39 = vadd.f32 %v1079_v63, %v994_v31 }
 0x2b7   : > { %v2786_v28 = vadd.f32 %v1143_v60, %v1058_v40 }
 0x2b9   : > { %vm1323_vm2 = vweird.f32 %v2786_v28 }
 0x2ba   : > { %1218 = vrot.lane.b32.xlu0 %v2481_v50, %s1869_s14  ;;  %1222 = vrot.lane.b32.xlu2 %v2607_v48, %s1869_s14 }
 0x2bb   : > { %1220 = vrot.lane.b32.xlu1 %v2565_v33, %s1869_s14 }
 0x2bc   : > { %v887_v9 = vpop.permute.xlu0 %886  ;;  %v1081_v51 = vpop.permute.xlu2 %1080 }
 0x2bd   : > { %v922_v57 = vadd.f32 %v2592_v17, %v887_v9  ;;  %v1159_v43 = vpop.permute.xlu1 %1158  ;;  %v915_v17 = vadd.f32 %v2631_v10, %v873_v11 }
 0x2bf   : > { %v1066_v20 = vadd.f32 %v1031_v27, %v922_v57 }
 0x2c1   : > { %v2795_v30 = vadd.f32 %v1159_v43, %v1066_v20 }
 0x2c2   : > { %1224 = vrot.lane.b32.xlu0 %v2657_v35, %s1869_s14  ;;  %1228 = vrot.lane.b32.xlu2 %v2752_v37, %s1869_s14 }
 0x2c3   : > { %1226 = vrot.lane.b32.xlu1 %v2711_v6, %s1869_s14  ;;  %vm1435_vm14 = vweird.f32 %v2795_v30 }
 0x2c4   : > { %v1095_v50 = vpop.permute.xlu0 %1094  ;;  %v1161_v60 = vpop.permute.xlu2 %1160 }
 0x2c5   : > { %v967_v33 = vpop.permute.xlu1 %966 }
 0x2c6   : > { %v1002_v23 = vadd.f32 %v967_v33, %v2607_v48 }
 0x2c8   : > { %v2804_v44 = vadd.f32 %v1095_v50, %v1002_v23 }
 0x2cc   : > { %v1145_v18 = vpop.permute.xlu0 %1144  ;;  %v969_v61 = vpop.permute.xlu2 %968 }
 0x2cd   : > { %v1017_v55 = vpop.permute.xlu1 %1016  ;;  %v1003_v48 = vadd.f32 %v969_v61, %v2657_v35 }
 0x2ce   : > { %v1059_v41 = vadd.f32 %v1017_v55, %v915_v17 }
 0x2d0   : > { %v2807_v58 = vadd.f32 %v1145_v18, %v1059_v41 }
 0x2d4   : > { %v1019_v36 = vpop.permute.xlu2 %1018  ;;  %v953_v25 = vpop.permute.xlu0 %952 }
 0x2d5   : > { %v889_v7 = vpop.permute.xlu1 %888  ;;  %v995_v22 = vadd.f32 %v953_v25, %v2642_v34 }
 0x2d6   : > { %v923_v8 = vadd.f32 %v2644_v26, %v889_v7 }
 0x2d7   : > { %v2810_v32 = vadd.f32 %v1081_v51, %v995_v22 }
 0x2dc   : > { %v2814_v12 = vpop.permute.xlu2 %890  ;;  %v1033_v10 = vpop.permute.xlu0 %1032 }
 0x2dd   : > { %v1097_v42 = vpop.permute.xlu1 %1096  ;;  %v1067_v49 = vadd.f32 %v1033_v10, %v923_v8 }
 0x2de   : > { %v2816_v14 = vadd.f32 %v1097_v42, %v1003_v48 }
 0x2df   : > { %v2818_v0 = vadd.f32 %v1161_v60, %v1067_v49 }
 0x2e4   : > { %v2820_v46 = vpop.permute.xlu2 %1098  ;;  %v875_v45 = vpop.permute.xlu0 %874 }
 0x2e5   : > { %v1147_v16 = vpop.permute.xlu1 %1146  ;;  %v916_v34 = vadd.f32 %v2670_v15, %v875_v45 }
 0x2e7   : > { %v1060_v21 = vadd.f32 %v1019_v36, %v916_v34 }
 0x2e9   : > { %v1188_v27 = vadd.f32 %v1147_v16, %v1060_v21 }
 0x2eb   : > { %1740 = vrcp.f32 %v1188_v27  ;;  %v1357_v23 = vand.u32 2147483648, %v1188_v27  ;;  %vm1351_vm5 = vweird.f32 %v1188_v27  ;;  %v1355_v17 = vand.u32 2147483647, %v1188_v27 }
 0x2ec   : > { %v1149_v26 = vpop.permute.xlu2 %1148  ;;  %v1083_v35 = vpop.permute.xlu0 %1082  ;;  %1742 = vrcp.f32 %v2672_v38 }
 0x2ed   : > { %v955_v3 = vpop.permute.xlu1 %954  ;;  %1744 = vrcp.f32 %v2795_v30  ;;  %v1358_v22 = vor.u32 1.1754944e-38, %v1357_v23  ;;  %vm1356_vm7 = vcmp.eq.f32.partialorder %v1355_v17, 8.507059e+37 }
 0x2ee   : > { %1746 = vrcp.f32 %v2609_v62  ;;  %v996_v50 = vadd.f32 %v955_v3, %v2688_v2  ;;  %v1399_v3 = vand.u32 2147483648, %v2672_v38 }
 0x2ef   : > { %1748 = vrcp.f32 %v2786_v28 }
 0x2f0   : > { %1750 = vrcp.f32 %v2807_v58  ;;  %v1124_v36 = vadd.f32 %v1083_v35, %v996_v50 }
 0x2f1   : > { %v1741_v5 = vpop.eup %1740  ;;  %1752 = vrcp.f32 %v2729_v52 }
 0x2f2   : > { %v1347_v1 = vmul.f32 %v1741_v5, %v1188_v27  ;;  %v2830_v40 = vpop.eup %1742  ;;  %vm1352_vm4 = vweird.f32 %v1741_v5 }
 0x2f3   : > { %v1389_v15 = vmul.f32 %v2830_v40, %v2672_v38  ;;  %v2839_v33 = vpop.eup %1744  ;;  %vm2843_vm6 = vmor %vm1351_vm5, %vm1352_vm4  ;;  %vm1394_vm8 = vweird.f32 %v2830_v40 }
 0x2f4   : > { %v2824_v31 = vpop.permute.xlu0 %1162  ;;  %v2826_v29 = vpop.permute.xlu2 %956  ;;  %v1348_v63 = vsub.f32 1.0, %v1347_v1  ;;  %v1431_v2 = vmul.f32 %v2839_v33, %v2795_v30  ;;  %vm2874_vm10 = vmor %vm1393_vm9, %vm1394_vm8  ;;  %vm1436_vm12 = vweird.f32 %v2839_v33  ;;  %vm1337_vm8 = vweird.f32 %v2807_v58 }
 0x2f5   : > { %v2828_v11 = vpop.permute.xlu1 %1034  ;;  %v1390_v20 = vsub.f32 1.0, %v1389_v15  ;;  %v2848_v55 = vpop.eup %1746  ;;  %vm2911_vm15 = vmor %vm1435_vm14, %vm1436_vm12 }
 0x2f6   : > { %v1349_v9 = vmul.f32 %v1741_v5, %v1348_v63  ;;  %v2857_v49 = vpop.eup %1748  ;;  %v1432_v21 = vsub.f32 1.0, %v1431_v2  ;;  %vm1380_vm0 = vweird.f32 %v2848_v55 }
 0x2f7   : > { %v1391_v61 = vmul.f32 %v2830_v40, %v1390_v20  ;;  %v2863_v34 = vpop.eup %1750  ;;  %v1319_v63 = vmul.f32 %v2857_v49, %v2786_v28  ;;  %v1400_v20 = vor.u32 1.1754944e-38, %v1399_v3  ;;  %vm1324_vm4 = vweird.f32 %v2857_v49 }
 0x2f8   : > { %v1350_v60 = vadd.f32 %v1741_v5, %v1349_v9  ;;  %vm1338_vm5 = vweird.f32 %v2863_v34 }
 0x2f9   : > { %v1392_v16 = vadd.f32 %v2830_v40, %v1391_v61  ;;  %v1320_v2 = vsub.f32 1.0, %v1319_v63  ;;  %vm2963_vm9 = vmor %vm1337_vm8, %vm1338_vm5 }
 0x2fa   : > { %v1354_v25 = vsel %vm2843_vm6, %v1741_v5, %v1350_v60  ;;  %v1397_v5 = vand.u32 2147483647, %v2672_v38  ;;  %v1433_v38 = vmul.f32 %v2839_v33, %v1432_v21  ;;  %v2887_v60 = vpop.eup %1752  ;;  %vm2947_vm6 = vmor %vm1379_vm13, %vm1380_vm0 }
 0x2fb   : > { %v1359_v45 = vsel %vm1356_vm7, %v1358_v22, %v1354_v25  ;;  %v1396_v9 = vsel %vm2874_vm10, %v2830_v40, %v1392_v16  ;;  %vm2953_vm7 = vmor %vm1323_vm2, %vm1324_vm4 }
 0x2fc   : > { %v2835_v51 = vpop.permute.xlu0 %970  ;;  %v1037_v57 = vpop.permute.xlu2 %1036  ;;  %vm1398_vm11 = vcmp.eq.f32.partialorder %v1397_v5, 8.507059e+37 }
 0x2fd   : > { %v877_v43 = vpop.permute.xlu1 %876  ;;  %v1401_v61 = vsel %vm1398_vm11, %v1400_v20, %v1396_v9 }
 0x2fe   : > { %v917_v41 = vadd.f32 %v2713_v56, %v877_v43  ;;  %v1375_v56 = vmul.f32 %v2848_v55, %v2609_v62 }
 0x300   : > { %v1376_v15 = vsub.f32 1.0, %v1375_v56  ;;  %v1321_v56 = vmul.f32 %v2857_v49, %v1320_v2  ;;  %v1383_v2 = vand.u32 2147483647, %v2609_v62 }
 0x302   : > { %vm1384_vm4 = vcmp.eq.f32.partialorder %v1383_v2, 8.507059e+37 }
 0x304   : > { %v1021_v7 = vpop.permute.xlu0 %1020  ;;  %v1211_v8 = vpop.permute.xlu2 %1210 }
 0x305   : > { %v1061_v48 = vadd.f32 %v1021_v7, %v917_v41  ;;  %v2855_v10 = vpop.permute.xlu1 %1084  ;;  %v1252_v42 = vadd.f32 %v1211_v8, %v1124_v36  ;;  %v1377_v36 = vmul.f32 %v2848_v55, %v1376_v15  ;;  %v1434_v7 = vadd.f32 %v2839_v33, %v1433_v38 }
 0x306   : > { %v1403_v8 = vmul.f32 %v2887_v60, %v2729_v52  ;;  %v1322_v38 = vadd.f32 %v2857_v49, %v1321_v56 }
 0x307   : > { %v2866_v27 = vadd.f32 %v1149_v26, %v1061_v48  ;;  %v1492_v35 = vmul.f32 %v1359_v45, %v1252_v42  ;;  %v1333_v26 = vmul.f32 %v2863_v34, %v2807_v58  ;;  %v1439_v45 = vand.u32 2147483647, %v2795_v30 }
 0x308   : > { %v1404_v63 = vsub.f32 1.0, %v1403_v8 }
 0x309   : > { %1508 = vst.msk [vmem:[%s2619_s7 + $0x30] sm:$0xff] %vm731_vm1, %v1492_v35  ;;  %1754 = vrcp.f32 %v2866_v27  ;;  %v1334_v41 = vsub.f32 1.0, %v1333_v26  ;;  %v2918_v35 = vadd.f32 %v2848_v55, %v1377_v36  ;;  %vm1440_vm3 = vcmp.eq.f32.partialorder %v1439_v45, 8.507059e+37 }
 0x30a   : > { %1756 = vrcp.f32 %v2762_v19  ;;  %vm1365_vm0 = vweird.f32 %v2866_v27 }
 0x30b   : > { %v1335_v21 = vmul.f32 %v2863_v34, %v1334_v41 }
 0x30c   : > { %v893_v43 = vpop.permute.xlu0 %892  ;;  %v1217_v50 = vpop.permute.xlu2 %1216 }
 0x30d   : > { %v925_v23 = vadd.f32 %v2743_v13, %v893_v43  ;;  %v1165_v17 = vpop.permute.xlu1 %1164  ;;  %v1255_v18 = vadd.f32 %v1217_v50, %v2685_v53  ;;  %v1441_v13 = vand.u32 2147483648, %v2795_v30  ;;  %v1385_v53 = vand.u32 2147483648, %v2609_v62 }
 0x30e   : > { %v1438_v30 = vsel %vm2911_vm15, %v2839_v33, %v1434_v7  ;;  %v1329_v33 = vand.u32 2147483648, %v2786_v28  ;;  %v1336_v43 = vadd.f32 %v2863_v34, %v1335_v21  ;;  %v1326_v7 = vsel %vm2953_vm7, %v2857_v49, %v1322_v38 }
 0x30f   : > { %v1069_v40 = vadd.f32 %v1037_v57, %v925_v23  ;;  %v1495_v25 = vmul.f32 %v1401_v61, %v1255_v18  ;;  %v2894_v22 = vpop.eup %1754  ;;  %v924_v57 = vadd.f32 %v2699_v4, %v2814_v12  ;;  %v1442_v5 = vor.u32 1.1754944e-38, %v1441_v13 }
 0x310   : > { %v2901_v48 = vpop.eup %1756  ;;  %v1361_v12 = vmul.f32 %v2894_v22, %v2866_v27  ;;  %v1343_v23 = vand.u32 2147483648, %v2807_v58  ;;  %v1341_v61 = vand.u32 2147483647, %v2807_v58  ;;  %v1340_v13 = vsel %vm2963_vm9, %v2863_v34, %v1336_v43 }
 0x311   : > { %v2905_v42 = vadd.f32 %v1165_v17, %v1069_v40  ;;  %1511 = vst.msk [vmem:[%s2619_s7 + $0x48] sm:$0xff] %vm731_vm1, %v1495_v25  ;;  %v1068_v4 = vadd.f32 %v2828_v11, %v924_v57  ;;  %v2931_v26 = vmul.f32 %v2901_v48, %v2762_v19  ;;  %v1443_v9 = vsel %vm1440_vm3, %v1442_v5, %v1438_v30 }
 0x312   : > { %v1362_v17 = vsub.f32 1.0, %v1361_v12  ;;  %v1382_v40 = vsel %vm2947_vm6, %v2848_v55, %v2918_v35  ;;  %v1386_v25 = vor.u32 1.1754944e-38, %v1385_v53  ;;  %v1330_v55 = vor.u32 1.1754944e-38, %v1329_v33 }
 0x313   : > { %1758 = vrcp.f32 %v2905_v42  ;;  %v2940_v20 = vadd.f32 %v2824_v31, %v1068_v4  ;;  %v1327_v31 = vand.u32 2147483647, %v2786_v28  ;;  %v2972_v28 = vmul.f32 %v2887_v60, %v1404_v63 }
 0x314   : > { %v1101_v3 = vpop.permute.xlu0 %1100  ;;  %v1223_v1 = vpop.permute.xlu2 %1222  ;;  %v1418_v58 = vsub.f32 1.0, %v2931_v26  ;;  %1760 = vrcp.f32 %v2818_v0  ;;  %v1344_v53 = vor.u32 1.1754944e-38, %v1343_v23  ;;  %v1363_v8 = vmul.f32 %v2894_v22, %v1362_v17 }
 0x315   : > { %v973_v11 = vpop.permute.xlu1 %972  ;;  %v1258_v15 = vadd.f32 %v1223_v1, %v2804_v44  ;;  %1762 = vrcp.f32 %v2940_v20  ;;  %vm1328_vm10 = vcmp.eq.f32.partialorder %v1327_v31, 8.507059e+37  ;;  %vm1342_vm11 = vcmp.eq.f32.partialorder %v1341_v61, 8.507059e+37 }
 0x316   : > { %v1005_v45 = vadd.f32 %v973_v11, %v2752_v37  ;;  %v1331_v56 = vsel %vm1328_vm10, %v1330_v55, %v1326_v7  ;;  %v1345_v49 = vsel %vm1342_vm11, %v1344_v53, %v1340_v13  ;;  %v1483_v4 = vand.u32 2147483648, %v2905_v42 }
 0x317   : > { %v1498_v50 = vmul.f32 %v1443_v9, %v1258_v15  ;;  %v1481_v12 = vand.u32 2147483647, %v2905_v42  ;;  %v1364_v37 = vadd.f32 %v2894_v22, %v1363_v8  ;;  %vm1366_vm13 = vweird.f32 %v2894_v22 }
 0x318   : > { %v1133_v11 = vadd.f32 %v1101_v3, %v1005_v45  ;;  %vm1477_vm14 = vweird.f32 %v2905_v42  ;;  %v997_v33 = vadd.f32 %v2826_v29, %v2732_v54  ;;  %v1484_v9 = vor.u32 1.1754944e-38, %v1483_v4  ;;  %vm3009_vm3 = vmor %vm1365_vm0, %vm1366_vm13 }
 0x319   : > { %v1759_v41 = vpop.eup %1758  ;;  %1514 = vst.msk [vmem:[%s2619_s7 + $0x60] sm:$0xff] %vm731_vm1, %v1498_v50  ;;  %v1369_v38 = vand.u32 2147483647, %v2866_v27  ;;  %vm1482_vm2 = vcmp.eq.f32.partialorder %v1481_v12, 8.507059e+37  ;;  %v1419_v54 = vmul.f32 %v2901_v48, %v1418_v58  ;;  %vm1407_vm6 = vweird.f32 %v2729_v52 }
 0x31a   : > { %v1473_v62 = vmul.f32 %v1759_v41, %v2905_v42  ;;  %vm1478_vm12 = vweird.f32 %v1759_v41  ;;  %v2993_v63 = vpop.eup %1760  ;;  %v1125_v29 = vadd.f32 %v2855_v10, %v997_v33  ;;  %v1406_v58 = vadd.f32 %v2887_v60, %v2972_v28 }
 0x31b   : > { %vm1479_vm15 = vmor %vm1477_vm14, %vm1478_vm12  ;;  %v1445_v23 = vmul.f32 %v2993_v63, %v2818_v0  ;;  %vm1370_vm5 = vcmp.eq.f32.partialorder %v1369_v38, 8.507059e+37  ;;  %vm1408_vm7 = vweird.f32 %v2887_v60  ;;  %vm1422_vm8 = vweird.f32 %v2901_v48 }
 0x31c   : > { %v1474_v57 = vsub.f32 1.0, %v1473_v62  ;;  %v1207_v16 = vpop.permute.xlu0 %1206  ;;  %v1229_v1 = vpop.permute.xlu2 %1228  ;;  %v1420_v62 = vadd.f32 %v2901_v48, %v1419_v54  ;;  %v1413_v7 = vand.u32 2147483648, %v2729_v52  ;;  %v1427_v13 = vand.u32 2147483648, %v2762_v19  ;;  %vm3037_vm9 = vmor %vm1407_vm6, %vm1408_vm7 }
 0x31d   : > { %v1250_v21 = vadd.f32 %v1207_v16, %v2784_v39  ;;  %v1209_v35 = vpop.permute.xlu1 %1208  ;;  %v1371_v39 = vand.u32 2147483648, %v2866_v27  ;;  %v1261_v43 = vadd.f32 %v1229_v1, %v1133_v11  ;;  %v1368_v27 = vsel %vm3009_vm3, %v2894_v22, %v1364_v37 }
 0x31e   : > { %v1251_v34 = vadd.f32 %v1209_v35, %v2810_v32  ;;  %v1475_v30 = vmul.f32 %v1759_v41, %v1474_v57  ;;  %v2996_v32 = vpop.eup %1762  ;;  %v1411_v28 = vand.u32 2147483647, %v2729_v52  ;;  %vm1421_vm10 = vweird.f32 %v2762_v19 }
 0x31f   : > { %v1490_v5 = vmul.f32 %v1331_v56, %v1250_v21  ;;  %v1372_v44 = vor.u32 1.1754944e-38, %v1371_v39  ;;  %v1459_v31 = vmul.f32 %v2996_v32, %v2940_v20  ;;  %v1425_v53 = vand.u32 2147483647, %v2762_v19  ;;  %vm1423_vm11 = vmor %vm1421_vm10, %vm1422_vm8 }
 0x320   : > { %v1491_v26 = vmul.f32 %v1345_v49, %v1251_v34  ;;  %v1476_v15 = vadd.f32 %v1759_v41, %v1475_v30  ;;  %v1410_v8 = vsel %vm3037_vm9, %v2887_v60, %v1406_v58  ;;  %v1424_v57 = vsel %vm1423_vm11, %v2901_v48, %v1420_v62 }
 0x321   : > { %1506 = vst.msk [vmem:[%s2619_s7 + $0x20] sm:$0xff] %vm731_vm1, %v1490_v5  ;;  %v1373_v22 = vsel %vm1370_vm5, %v1372_v44, %v1368_v27  ;;  %v1460_v55 = vsub.f32 1.0, %v1459_v31  ;;  %v1414_v16 = vor.u32 1.1754944e-38, %v1413_v7  ;;  %v1428_v21 = vor.u32 1.1754944e-38, %v1427_v13 }
 0x322   : > { %1507 = vst.msk [vmem:[%s2619_s7 + $0x28] sm:$0xff] %vm731_vm1, %v1491_v26  ;;  %v1480_v3 = vsel %vm1479_vm15, %v1759_v41, %v1476_v15  ;;  %v1387_v41 = vsel %vm1384_vm4, %v1386_v25, %v1382_v40  ;;  %v1446_v40 = vsub.f32 1.0, %v1445_v23  ;;  %vm1412_vm12 = vcmp.eq.f32.partialorder %v1411_v28, 8.507059e+37 }
 0x323   : > { %v1485_v50 = vsel %vm1482_vm2, %v1484_v9, %v1480_v3  ;;  %v1461_v52 = vmul.f32 %v2996_v32, %v1460_v55  ;;  %vm1426_vm13 = vcmp.eq.f32.partialorder %v1425_v53, 8.507059e+37  ;;  %v1415_v35 = vsel %vm1412_vm12, %v1414_v16, %v1410_v8 }
 0x324   : > { %v1501_v17 = vmul.f32 %v1485_v50, %v1261_v43  ;;  %v1213_v18 = vpop.permute.xlu0 %1212  ;;  %v1447_v45 = vmul.f32 %v2993_v63, %v1446_v40  ;;  %v1429_v4 = vsel %vm1426_vm13, %v1428_v21, %v1424_v57  ;;  %vm1450_vm14 = vweird.f32 %v2993_v63 }
 0x325   : > { %v1253_v61 = vadd.f32 %v1213_v18, %v1125_v29  ;;  %v1215_v10 = vpop.permute.xlu1 %1214  ;;  %v1455_v30 = vand.u32 2147483648, %v2818_v0  ;;  %v1004_v12 = vadd.f32 %v2835_v51, %v2711_v6  ;;  %vm1464_vm15 = vweird.f32 %v2996_v32 }
 0x326   : > { %1517 = vst.msk [vmem:[%s2619_s7 + $0x78] sm:$0xff] %vm731_vm1, %v1501_v17  ;;  %v1254_v36 = vadd.f32 %v1215_v10, %v2629_v59  ;;  %v1448_v48 = vadd.f32 %v2993_v63, %v1447_v45  ;;  %vm1449_vm0 = vweird.f32 %v2818_v0  ;;  %v1469_v1 = vand.u32 2147483648, %v2940_v20 }
 0x327   : > { %v1493_v2 = vmul.f32 %v1373_v22, %v1253_v61  ;;  %vm1451_vm2 = vmor %vm1449_vm0, %vm1450_vm14  ;;  %vm1463_vm3 = vweird.f32 %v2940_v20  ;;  %v1467_v6 = vand.u32 2147483647, %v2940_v20  ;;  %v1456_v37 = vor.u32 1.1754944e-38, %v1455_v30 }
 0x328   : > { %v1494_v25 = vmul.f32 %v1387_v41, %v1254_v36  ;;  %v1452_v51 = vsel %vm1451_vm2, %v2993_v63, %v1448_v48  ;;  %vm1465_vm4 = vmor %vm1463_vm3, %vm1464_vm15  ;;  %v1132_v26 = vadd.f32 %v2820_v46, %v1004_v12  ;;  %v1470_v15 = vor.u32 1.1754944e-38, %v1469_v1 }
 0x329   : > { %1509 = vst.msk [vmem:[%s2619_s7 + $0x38] sm:$0xff] %vm731_vm1, %v1493_v2  ;;  %vm1468_vm6 = vcmp.eq.f32.partialorder %v1467_v6, 8.507059e+37 }
 0x32a   : > { %1510 = vst.msk [vmem:[%s2619_s7 + $0x40] sm:$0xff] %vm731_vm1, %v1494_v25 }
 0x32c   : > { %v1219_v56 = vpop.permute.xlu0 %1218 }
 0x32d   : > { %v1256_v19 = vadd.f32 %v1219_v56, %v2726_v47  ;;  %v1221_v49 = vpop.permute.xlu1 %1220  ;;  %v1462_v47 = vadd.f32 %v2996_v32, %v1461_v52 }
 0x32e   : > { %v1257_v60 = vadd.f32 %v1221_v49, %v2774_v24  ;;  %v1453_v24 = vand.u32 2147483647, %v2818_v0 }
 0x32f   : > { %v1496_v34 = vmul.f32 %v1415_v35, %v1256_v19  ;;  %v1466_v0 = vsel %vm1465_vm4, %v2996_v32, %v1462_v47 }
 0x330   : > { %v1497_v5 = vmul.f32 %v1429_v4, %v1257_v60  ;;  %vm1454_vm5 = vcmp.eq.f32.partialorder %v1453_v24, 8.507059e+37  ;;  %v1471_v3 = vsel %vm1468_vm6, %v1470_v15, %v1466_v0 }
 0x331   : > { %1512 = vst.msk [vmem:[%s2619_s7 + $0x50] sm:$0xff] %vm731_vm1, %v1496_v34  ;;  %v1457_v9 = vsel %vm1454_vm5, %v1456_v37, %v1452_v51 }
 0x332   : > { %1513 = vst.msk [vmem:[%s2619_s7 + $0x58] sm:$0xff] %vm731_vm1, %v1497_v5 }
 0x334   : > { %v1225_v39 = vpop.permute.xlu0 %1224 }
 0x335   : > { %v1259_v11 = vadd.f32 %v1225_v39, %v2816_v14  ;;  %v1227_v33 = vpop.permute.xlu1 %1226 }
 0x336   : > { %v1260_v38 = vadd.f32 %v1227_v33, %v1132_v26 }
 0x337   : > { %v1499_v20 = vmul.f32 %v1457_v9, %v1259_v11 }
 0x338   : > { %v1500_v63 = vmul.f32 %v1471_v3, %v1260_v38 }
 0x339   : > { %1515 = vst.msk [vmem:[%s2619_s7 + $0x68] sm:$0xff] %vm731_vm1, %v1499_v20 }
 0x33a   : > { %1516 = vst.msk [vmem:[%s2619_s7 + $0x70] sm:$0xff] %vm731_vm1, %v1500_v63 }
 0x33b PF: > { %p13_p4 = scmp.ge.s32.totalorder %s1933_s22, 4   ;;  %s3114_s9 = smov %s1854_s10 }
 0x33c   : > { %s3115_s10 = smov %s1858_s11  ;;  %s3116_s11 = smov %s1943_s27 }
 0x33d   : > { %s3117_s12 = smov %s1933_s22  ;;  %15 = sbr.rel (!%p13_p4) target bundleno = 4 (0x4), region = 72 }
 0x342   :  { %1540 = vsyncpa [#allocation3], 1 }
 0x343   :  { %1542 = vsyncpa [#allocation3 + $0x1], 1 }
 0x344   :  { %1543 = vsyncpa [#allocation5], 1 }

</bundles_post_ra>
